<compile_context>
chip_gen: v7x
topology: tpu7x:2x2x1
jax: 0.10.0
libtpu: 0.0.40
codegen_flags: <defaults>
</compile_context>

<pallas_src>
import functools

import jax
import jax.numpy as jnp
from jax.experimental import pallas as pl
from jax.experimental.pallas import tpu as pltpu

NEG_SLOPE = 0.1
VMEM_LIMIT = 32 * 1024 * 1024  # safe on v5e/v6e (128 MiB) and v7x (64 MiB)


# ----------------------------- helpers ---------------------------------------
def _round_up(x, m):
    return (x + m - 1) // m * m


def _pick_tk(K, max_tk=512):
    """K-tile: tile only when K is large and 128-aligned, else keep full K."""
    if K <= max_tk or K % 128 != 0:
        return K
    for tk in (512, 256, 128):
        if K % tk == 0:
            return tk
    return K


def _leaky(y):
    # slope in (0,1): max(y, 0.1*y) == LeakyReLU(0.1)(y); one VALU max, no select.
    return jnp.maximum(y, NEG_SLOPE * y)


# ----------------------------- Pallas kernels --------------------------------
def _mm_kernel(x_ref, w_ref, b_ref, o_ref, acc_ref, *, activate):
    """Tiled y = x @ w (+ b, LeakyReLU) with f32 accumulator over the K grid axis."""
    k = pl.program_id(1)

    @pl.when(k == 0)
    def _init():
        acc_ref[...] = jnp.zeros_like(acc_ref)

    acc_ref[...] += jnp.dot(x_ref[...], w_ref[...],
                            preferred_element_type=jnp.float32)

    @pl.when(k == pl.num_programs(1) - 1)
    def _finalize():
        y = acc_ref[...] + b_ref[...]          # bias only once, in f32
        if activate:
            y = _leaky(y)
        o_ref[...] = y.astype(o_ref.dtype)


def _fc_fused_kernel(x_ref, w1_ref, b1_ref, w2_ref, b2_ref, o_ref, acc_ref):
    """fc1 (K->128) accumulated over K tiles; LeakyReLU + fc2 (128->1) fused into finalize."""
    k = pl.program_id(1)

    @pl.when(k == 0)
    def _init():
        acc_ref[...] = jnp.zeros_like(acc_ref)

    acc_ref[...] += jnp.dot(x_ref[...], w1_ref[...],
                            preferred_element_type=jnp.float32)

    @pl.when(k == pl.num_programs(1) - 1)
    def _finalize():
        h = _leaky(acc_ref[...] + b1_ref[...])             # (TM, 128) f32
        y = jnp.dot(h.astype(jnp.bfloat16), w2_ref[...],
                    preferred_element_type=jnp.float32) + b2_ref[...]
        o_ref[...] = y.astype(o_ref.dtype)


# ----------------------------- Pallas wrappers --------------------------------
def pallas_matmul_bias_act(x, w, b, *, activate, out_dtype=jnp.float32):
    """x: (M, K), w: (K, N) (bf16), b: (N,) f32 -> (M, N) out_dtype."""
    M, K = x.shape
    Kw, N = w.shape
    assert K == Kw

    TM = min(512, _round_up(max(M, 1), 8))
    Mp = _round_up(M, TM)
    TK = _pick_tk(K)

    xb = x.astype(jnp.bfloat16)
    if Mp != M:
        xb = jnp.pad(xb, ((0, Mp - M), (0, 0)))
    wb = w.astype(jnp.bfloat16)
    b2 = b.astype(jnp.float32).reshape(1, N)

    kernel = functools.partial(_mm_kernel, activate=activate)
    out_itemsize = jnp.dtype(out_dtype).itemsize
    bytes_accessed = (Mp * K * 2 + (Mp // TM) * K * N * 2 + N * 4
                      + Mp * N * out_itemsize)

    out = pl.pallas_call(
        kernel,
        out_shape=jax.ShapeDtypeStruct((Mp, N), out_dtype),
        grid_spec=pltpu.PrefetchScalarGridSpec(
            num_scalar_prefetch=0,
            grid=(Mp // TM, K // TK),
            in_specs=[
                pl.BlockSpec((TM, TK), lambda i, k: (i, k)),
                pl.BlockSpec((TK, N), lambda i, k: (k, 0)),
                pl.BlockSpec((1, N), lambda i, k: (0, 0)),
            ],
            out_specs=pl.BlockSpec((TM, N), lambda i, k: (i, 0)),
            scratch_shapes=[pltpu.VMEM((TM, N), jnp.float32)],
        ),
        compiler_params=pltpu.CompilerParams(
            dimension_semantics=("parallel", "arbitrary"),
            vmem_limit_bytes=VMEM_LIMIT,
        ),
        cost_estimate=pl.CostEstimate(
            flops=2 * Mp * N * K,
            transcendentals=0,
            bytes_accessed=int(bytes_accessed)),
    )(xb, wb, b2)

    return out[:M] if Mp != M else out


def pallas_fc_fused(x, w1, b1, w2, b2):
    """Fused fc1(K->H)+LeakyReLU+fc2(H->1). x:(M,K), w1:(K,H), w2:(H,1)."""
    M, K = x.shape
    H = w1.shape[1]

    TM = min(512, _round_up(max(M, 1), 8))
    Mp = _round_up(M, TM)
    TK = _pick_tk(K)

    xb = x.astype(jnp.bfloat16)
    if Mp != M:
        xb = jnp.pad(xb, ((0, Mp - M), (0, 0)))
    w1b = w1.astype(jnp.bfloat16)
    w2b = w2.astype(jnp.bfloat16)
    b1f = b1.astype(jnp.float32).reshape(1, H)
    b2f = b2.astype(jnp.float32).reshape(1, 1)

    bytes_accessed = Mp * K * 2 + K * H * 2 + H * 4 + H * 2 + 4 + Mp * 4

    out = pl.pallas_call(
        _fc_fused_kernel,
        out_shape=jax.ShapeDtypeStruct((Mp, 1), jnp.float32),
        grid_spec=pltpu.PrefetchScalarGridSpec(
            num_scalar_prefetch=0,
            grid=(Mp // TM, K // TK),
            in_specs=[
                pl.BlockSpec((TM, TK), lambda i, k: (i, k)),
                pl.BlockSpec((TK, H), lambda i, k: (k, 0)),
                pl.BlockSpec((1, H), lambda i, k: (0, 0)),
                pl.BlockSpec((H, 1), lambda i, k: (0, 0)),
                pl.BlockSpec((1, 1), lambda i, k: (0, 0)),
            ],
            out_specs=pl.BlockSpec((TM, 1), lambda i, k: (i, 0)),
            scratch_shapes=[pltpu.VMEM((TM, H), jnp.float32)],
        ),
        compiler_params=pltpu.CompilerParams(
            dimension_semantics=("parallel", "arbitrary"),
            vmem_limit_bytes=VMEM_LIMIT,
        ),
        cost_estimate=pl.CostEstimate(
            flops=2 * Mp * H * K + 2 * Mp * H,
            transcendentals=0,
            bytes_accessed=int(bytes_accessed)),
    )(xb, w1b, b1f, w2b, b2f)

    return out[:M] if Mp != M else out


# ----------------------------- JAX glue ---------------------------------------
def im2col_nhwc(x, k=4, stride=2, pad=1):
    """x: (B, H, W, C) NHWC -> patches (B*Ho*Wo, k*k*C) with (kh, kw, c) order."""
    B, H, W, C = x.shape
    Ho = (H + 2 * pad - k) // stride + 1
    Wo = (W + 2 * pad - k) // stride + 1
    xp = jnp.pad(x, ((0, 0), (pad, pad), (pad, pad), (0, 0)))
    cols = []
    for ki in range(k):
        for kj in range(k):
            cols.append(
                xp[:,
                   ki: ki + stride * (Ho - 1) + 1: stride,
                   kj: kj + stride * (Wo - 1) + 1: stride,
                   :]
            )
    patches = jnp.stack(cols, axis=3)                    # (B, Ho, Wo, k*k, C)
    patches = patches.reshape(B * Ho * Wo, k * k * C)
    return patches, Ho, Wo, B


def _l2normalize(v, eps=1e-12):
    return v / (jnp.linalg.norm(v) + eps)


def spectral_normalize(w2d, key, n_iter=1):
    """PyTorch-style SpectralNorm (power iteration) on the (height, width) weight view."""
    u = _l2normalize(jax.random.normal(key, (w2d.shape[0],), jnp.float32))
    v = _l2normalize(w2d.T @ u)
    for _ in range(n_iter):
        v = _l2normalize(w2d.T @ u)
        u = _l2normalize(w2d @ v)
    sigma = u @ (w2d @ v)
    return w2d / sigma


def init_params(key, channels, img_size):
    s = img_size // 8
    conv_shapes = [(64, channels), (128, 64), (256, 128)]
    keys = jax.random.split(key, 2 * len(conv_shapes) + 4)

    convs = []
    for i, (co, ci) in enumerate(conv_shapes):
        wk, uk = keys[2 * i], keys[2 * i + 1]
        w = jax.random.normal(wk, (co, ci, 4, 4), jnp.float32) * 0.05
        # spectral norm on PyTorch's weight.view(Cout, -1) = (Cout, Cin*kh*kw)
        w2d = spectral_normalize(w.reshape(co, -1), uk)
        w4d = w2d.reshape(co, ci, 4, 4)
        # permute once to (kh, kw, Cin, Cout) to match the NHWC im2col order
        w_mat = w4d.transpose(2, 3, 1, 0).reshape(16 * ci, co)
        b = jnp.zeros((co,), jnp.float32)
        convs.append((w_mat.astype(jnp.bfloat16), b))

    k6, k7, k8, k9 = keys[-4:]
    fc1_w = jax.random.normal(k6, (128, s * s * 256), jnp.float32) * 0.05
    fc1_w = spectral_normalize(fc1_w, k7)
    # PyTorch flattens NCHW (C,H,W); our activations flatten NHWC (H,W,C): permute.
    fc1_mat = fc1_w.reshape(128, 256, s, s).transpose(2, 3, 1, 0).reshape(s * s * 256, 128)
    fc1_b = jnp.zeros((128,), jnp.float32)

    fc2_w = jax.random.normal(k8, (1, 128), jnp.float32) * 0.05
    fc2_w = spectral_normalize(fc2_w, k9)
    fc2_mat = fc2_w.T                                    # (128, 1)
    fc2_b = jnp.zeros((1,), jnp.float32)

    return {"convs": convs,
            "fc1": (fc1_mat.astype(jnp.bfloat16), fc1_b),
            "fc2": (fc2_mat.astype(jnp.bfloat16), fc2_b)}


def discriminator_forward(params, img):
    """img: (B, C, H, W) NCHW -> (B, 1)."""
    x = jnp.transpose(img, (0, 2, 3, 1))                 # NCHW -> NHWC, once
    for (w_mat, b) in params["convs"]:
        patches, Ho, Wo, B = im2col_nhwc(x)
        c_out = w_mat.shape[1]
        # conv as matmul + bias + LeakyReLU(0.1); keep activations bf16 in HBM
        y = pallas_matmul_bias_act(patches, w_mat, b,
                                   activate=True, out_dtype=jnp.bfloat16)
        x = y.reshape(B, Ho, Wo, c_out)                  # already NHWC

    B = x.shape[0]
    x = x.reshape(B, -1)                                 # (H, W, C) flatten (weights match)

    fc1_w, fc1_b = params["fc1"]
    fc2_w, fc2_b = params["fc2"]
    return pallas_fc_fused(x, fc1_w, fc1_b, fc2_w, fc2_b)


if __name__ == "__main__":
    key = jax.random.PRNGKey(0)
    kparam, kimg = jax.random.split(key)

    batch, channels, img_size = 2, 3, 16                 # cifar-like, s = img_size/8 = 2
    params = init_params(kparam, channels, img_size)
    img = jax.random.normal(kimg, (batch, channels, img_size, img_size), jnp.float32)

    out = jax.jit(discriminator_forward)(params, img)
    out = jax.block_until_ready(out)
    assert out.shape == (batch, 1), out.shape
    print("KERNEL_OK")
</pallas_src>

<mosaic_0001>
module attributes {stable_mosaic.version = 11 : i64} {
  func.func @_mm_kernel(%arg0: i32, %arg1: i32, %arg2: memref<128x48xbf16, #tpu.memory_space<vmem>>, %arg3: memref<48x64xbf16, #tpu.memory_space<vmem>>, %arg4: memref<1x64xf32, #tpu.memory_space<vmem>>, %arg5: memref<128x64xbf16, #tpu.memory_space<vmem>>, %arg6: memref<128x64xf32, #tpu.memory_space<vmem>>) attributes {dimension_semantics = [#tpu.dimension_semantics<parallel>, #tpu.dimension_semantics<arbitrary>], iteration_bounds = array<i64: 1, 1>, scalar_prefetch = 0 : i64, scratch_operands = 1 : i64, tpu.core_type = #tpu.core_type<tc>, window_params = [{transform_indices = @transform_0, window_bounds = array<i64: 128, 48>}, {transform_indices = @transform_1, window_bounds = array<i64: 48, 64>}, {pipeline_mode = #tpu.pipeline_mode<synchronous>, transform_indices = @transform_2, window_bounds = array<i64: 1, 64>}, {transform_indices = @transform_3, window_bounds = array<i64: 128, 64>}]} {
    %c0_i32 = arith.constant 0 : i32
    %0 = arith.cmpi eq, %arg1, %c0_i32 : i32
    %1 = arith.extui %0 : i1 to i32
    %c0_i32_0 = arith.constant 0 : i32
    %2 = arith.cmpi ne, %1, %c0_i32_0 : i32
    scf.if %2 {
      %cst_10 = arith.constant 0.000000e+00 : f32
      %12 = vector.broadcast %cst_10 : f32 to vector<128x64xf32>
      %c0_11 = arith.constant 0 : index
      %c0_12 = arith.constant 0 : index
      %13 = vector.load %arg6[%c0_11, %c0_12] : memref<128x64xf32, #tpu.memory_space<vmem>>, vector<128x64xf32>
      tpu.vector_store %arg6[%c0_11, %c0_12], %12 {strides = array<i32>} : memref<128x64xf32, #tpu.memory_space<vmem>>, vector<128x64xf32>,
    } else {
    }
    %c0 = arith.constant 0 : index
    %c0_1 = arith.constant 0 : index
    %3 = vector.load %arg6[%c0, %c0_1] : memref<128x64xf32, #tpu.memory_space<vmem>>, vector<128x64xf32>
    %c0_2 = arith.constant 0 : index
    %c0_3 = arith.constant 0 : index
    %4 = vector.load %arg2[%c0_2, %c0_3] : memref<128x48xbf16, #tpu.memory_space<vmem>>, vector<128x48xbf16>
    %c0_4 = arith.constant 0 : index
    %c0_5 = arith.constant 0 : index
    %5 = vector.load %arg3[%c0_4, %c0_5] : memref<48x64xbf16, #tpu.memory_space<vmem>>, vector<48x64xbf16>
    %cst = arith.constant dense<0.000000e+00> : vector<128x64xf32>
    %6 = tpu.matmul %4, %5, %cst {dimension_numbers = #tpu.dot_dimension_numbers<[1], [0], [0], [1], [0, 0, 1, 1], [], []>} : vector<128x48xbf16>, vector<48x64xbf16>, vector<128x64xf32> -> vector<128x64xf32>
    %7 = arith.addf %3, %6 : vector<128x64xf32>
    %c0_6 = arith.constant 0 : index
    %c0_7 = arith.constant 0 : index
    %8 = vector.load %arg6[%c0_6, %c0_7] : memref<128x64xf32, #tpu.memory_space<vmem>>, vector<128x64xf32>
    tpu.vector_store %arg6[%c0_6, %c0_7], %7 {strides = array<i32>} : memref<128x64xf32, #tpu.memory_space<vmem>>, vector<128x64xf32>,
    %c0_i32_8 = arith.constant 0 : i32
    %9 = arith.cmpi eq, %arg1, %c0_i32_8 : i32
    %10 = arith.extui %9 : i1 to i32
    %c0_i32_9 = arith.constant 0 : i32
    %11 = arith.cmpi ne, %10, %c0_i32_9 : i32
    scf.if %11 {
      %c0_10 = arith.constant 0 : index
      %c0_11 = arith.constant 0 : index
      %12 = vector.load %arg6[%c0_10, %c0_11] : memref<128x64xf32, #tpu.memory_space<vmem>>, vector<128x64xf32>
      %c0_12 = arith.constant 0 : index
      %c0_13 = arith.constant 0 : index
      %13 = vector.load %arg4[%c0_12, %c0_13] : memref<1x64xf32, #tpu.memory_space<vmem>>, vector<1x64xf32>
      %14 = vector.broadcast %13 : vector<1x64xf32> to vector<128x64xf32>
      %15 = arith.addf %12, %14 : vector<128x64xf32>
      %cst_14 = arith.constant 1.000000e-01 : f32
      %16 = vector.broadcast %cst_14 : f32 to vector<128x64xf32>
      %17 = arith.mulf %16, %15 : vector<128x64xf32>
      %18 = arith.maximumf %15, %17 : vector<128x64xf32>
      %19 = arith.truncf %18 : vector<128x64xf32> to vector<128x64xbf16>
      %c0_15 = arith.constant 0 : index
      %c0_16 = arith.constant 0 : index
      %20 = vector.load %arg5[%c0_15, %c0_16] : memref<128x64xbf16, #tpu.memory_space<vmem>>, vector<128x64xbf16>
      tpu.vector_store %arg5[%c0_15, %c0_16], %19 {strides = array<i32>} : memref<128x64xbf16, #tpu.memory_space<vmem>>, vector<128x64xbf16>,
    } else {
    }
    return
  }
  func.func @transform_0(%arg0: i32, %arg1: i32) -> (i32, i32) {
    %c0_i32 = arith.constant 0 : i32
    return %arg0, %arg1 : i32, i32
  }
  func.func @transform_1(%arg0: i32, %arg1: i32) -> (i32, i32) {
    %c0_i32 = arith.constant 0 : i32
    %c0_i32_0 = arith.constant 0 : i32
    return %arg1, %c0_i32 : i32, i32
  }
  func.func @transform_2(%arg0: i32, %arg1: i32) -> (i32, i32) {
    %c0_i32 = arith.constant 0 : i32
    %c0_i32_0 = arith.constant 0 : i32
    %c0_i32_1 = arith.constant 0 : i32
    return %c0_i32, %c0_i32_0 : i32, i32
  }
  func.func @transform_3(%arg0: i32, %arg1: i32) -> (i32, i32) {
    %c0_i32 = arith.constant 0 : i32
    %c0_i32_0 = arith.constant 0 : i32
    return %arg0, %c0_i32 : i32, i32
  }
}

module attributes {stable_mosaic.version = 11 : i64} {
  func.func @_mm_kernel(%arg0: i32, %arg1: i32, %arg2: memref<32x512xbf16, #tpu.memory_space<vmem>>, %arg3: memref<512x128xbf16, #tpu.memory_space<vmem>>, %arg4: memref<1x128xf32, #tpu.memory_space<vmem>>, %arg5: memref<32x128xbf16, #tpu.memory_space<vmem>>, %arg6: memref<32x128xf32, #tpu.memory_space<vmem>>) attributes {dimension_semantics = [#tpu.dimension_semantics<parallel>, #tpu.dimension_semantics<arbitrary>], iteration_bounds = array<i64: 1, 2>, scalar_prefetch = 0 : i64, scratch_operands = 1 : i64, tpu.core_type = #tpu.core_type<tc>, window_params = [{transform_indices = @transform_0, window_bounds = array<i64: 32, 512>}, {transform_indices = @transform_1, window_bounds = array<i64: 512, 128>}, {pipeline_mode = #tpu.pipeline_mode<synchronous>, transform_indices = @transform_2, window_bounds = array<i64: 1, 128>}, {transform_indices = @transform_3, window_bounds = array<i64: 32, 128>}]} {
    %c0_i32 = arith.constant 0 : i32
    %0 = arith.cmpi eq, %arg1, %c0_i32 : i32
    %1 = arith.extui %0 : i1 to i32
    %c0_i32_0 = arith.constant 0 : i32
    %2 = arith.cmpi ne, %1, %c0_i32_0 : i32
    scf.if %2 {
      %cst_9 = arith.constant 0.000000e+00 : f32
      %12 = vector.broadcast %cst_9 : f32 to vector<32x128xf32>
      %c0_10 = arith.constant 0 : index
      %c0_11 = arith.constant 0 : index
      %13 = vector.load %arg6[%c0_10, %c0_11] : memref<32x128xf32, #tpu.memory_space<vmem>>, vector<32x128xf32>
      tpu.vector_store %arg6[%c0_10, %c0_11], %12 {strides = array<i32>} : memref<32x128xf32, #tpu.memory_space<vmem>>, vector<32x128xf32>,
    } else {
    }
    %c0 = arith.constant 0 : index
    %c0_1 = arith.constant 0 : index
    %3 = vector.load %arg6[%c0, %c0_1] : memref<32x128xf32, #tpu.memory_space<vmem>>, vector<32x128xf32>
    %c0_2 = arith.constant 0 : index
    %c0_3 = arith.constant 0 : index
    %4 = vector.load %arg2[%c0_2, %c0_3] : memref<32x512xbf16, #tpu.memory_space<vmem>>, vector<32x512xbf16>
    %c0_4 = arith.constant 0 : index
    %c0_5 = arith.constant 0 : index
    %5 = vector.load %arg3[%c0_4, %c0_5] : memref<512x128xbf16, #tpu.memory_space<vmem>>, vector<512x128xbf16>
    %cst = arith.constant dense<0.000000e+00> : vector<32x128xf32>
    %6 = tpu.matmul %4, %5, %cst {dimension_numbers = #tpu.dot_dimension_numbers<[1], [0], [0], [1], [0, 0, 1, 1], [], []>} : vector<32x512xbf16>, vector<512x128xbf16>, vector<32x128xf32> -> vector<32x128xf32>
    %7 = arith.addf %3, %6 : vector<32x128xf32>
    %c0_6 = arith.constant 0 : index
    %c0_7 = arith.constant 0 : index
    %8 = vector.load %arg6[%c0_6, %c0_7] : memref<32x128xf32, #tpu.memory_space<vmem>>, vector<32x128xf32>
    tpu.vector_store %arg6[%c0_6, %c0_7], %7 {strides = array<i32>} : memref<32x128xf32, #tpu.memory_space<vmem>>, vector<32x128xf32>,
    %c1_i32 = arith.constant 1 : i32
    %9 = arith.cmpi eq, %arg1, %c1_i32 : i32
    %10 = arith.extui %9 : i1 to i32
    %c0_i32_8 = arith.constant 0 : i32
    %11 = arith.cmpi ne, %10, %c0_i32_8 : i32
    scf.if %11 {
      %c0_9 = arith.constant 0 : index
      %c0_10 = arith.constant 0 : index
      %12 = vector.load %arg6[%c0_9, %c0_10] : memref<32x128xf32, #tpu.memory_space<vmem>>, vector<32x128xf32>
      %c0_11 = arith.constant 0 : index
      %c0_12 = arith.constant 0 : index
      %13 = vector.load %arg4[%c0_11, %c0_12] : memref<1x128xf32, #tpu.memory_space<vmem>>, vector<1x128xf32>
      %14 = vector.broadcast %13 : vector<1x128xf32> to vector<32x128xf32>
      %15 = arith.addf %12, %14 : vector<32x128xf32>
      %cst_13 = arith.constant 1.000000e-01 : f32
      %16 = vector.broadcast %cst_13 : f32 to vector<32x128xf32>
      %17 = arith.mulf %16, %15 : vector<32x128xf32>
      %18 = arith.maximumf %15, %17 : vector<32x128xf32>
      %19 = arith.truncf %18 : vector<32x128xf32> to vector<32x128xbf16>
      %c0_14 = arith.constant 0 : index
      %c0_15 = arith.constant 0 : index
      %20 = vector.load %arg5[%c0_14, %c0_15] : memref<32x128xbf16, #tpu.memory_space<vmem>>, vector<32x128xbf16>
      tpu.vector_store %arg5[%c0_14, %c0_15], %19 {strides = array<i32>} : memref<32x128xbf16, #tpu.memory_space<vmem>>, vector<32x128xbf16>,
    } else {
    }
    return
  }
  func.func @transform_0(%arg0: i32, %arg1: i32) -> (i32, i32) {
    %c0_i32 = arith.constant 0 : i32
    return %arg0, %arg1 : i32, i32
  }
  func.func @transform_1(%arg0: i32, %arg1: i32) -> (i32, i32) {
    %c0_i32 = arith.constant 0 : i32
    %c0_i32_0 = arith.constant 0 : i32
    return %arg1, %c0_i32 : i32, i32
  }
  func.func @transform_2(%arg0: i32, %arg1: i32) -> (i32, i32) {
    %c0_i32 = arith.constant 0 : i32
    %c0_i32_0 = arith.constant 0 : i32
    %c0_i32_1 = arith.constant 0 : i32
    return %c0_i32, %c0_i32_0 : i32, i32
  }
  func.func @transform_3(%arg0: i32, %arg1: i32) -> (i32, i32) {
    %c0_i32 = arith.constant 0 : i32
    %c0_i32_0 = arith.constant 0 : i32
    return %arg0, %c0_i32 : i32, i32
  }
}

module attributes {stable_mosaic.version = 11 : i64} {
  func.func @_fc_fused_kernel(%arg0: i32, %arg1: i32, %arg2: memref<8x512xbf16, #tpu.memory_space<vmem>>, %arg3: memref<512x128xbf16, #tpu.memory_space<vmem>>, %arg4: memref<1x128xf32, #tpu.memory_space<vmem>>, %arg5: memref<128x1xbf16, #tpu.memory_space<vmem>>, %arg6: memref<1x1xf32, #tpu.memory_space<vmem>>, %arg7: memref<8x1xf32, #tpu.memory_space<vmem>>, %arg8: memref<8x128xf32, #tpu.memory_space<vmem>>) attributes {dimension_semantics = [#tpu.dimension_semantics<parallel>, #tpu.dimension_semantics<arbitrary>], iteration_bounds = array<i64: 1, 2>, scalar_prefetch = 0 : i64, scratch_operands = 1 : i64, tpu.core_type = #tpu.core_type<tc>, window_params = [{transform_indices = @transform_0, window_bounds = array<i64: 8, 512>}, {transform_indices = @transform_1, window_bounds = array<i64: 512, 128>}, {pipeline_mode = #tpu.pipeline_mode<synchronous>, transform_indices = @transform_2, window_bounds = array<i64: 1, 128>}, {pipeline_mode = #tpu.pipeline_mode<synchronous>, transform_indices = @transform_3, window_bounds = array<i64: 128, 1>}, {pipeline_mode = #tpu.pipeline_mode<synchronous>, transform_indices = @transform_4, window_bounds = array<i64: 1, 1>}, {transform_indices = @transform_5, window_bounds = array<i64: 8, 1>}]} {
    %c0_i32 = arith.constant 0 : i32
    %0 = arith.cmpi eq, %arg1, %c0_i32 : i32
    %1 = arith.extui %0 : i1 to i32
    %c0_i32_0 = arith.constant 0 : i32
    %2 = arith.cmpi ne, %1, %c0_i32_0 : i32
    scf.if %2 {
      %cst_9 = arith.constant 0.000000e+00 : f32
      %12 = vector.broadcast %cst_9 : f32 to vector<8x128xf32>
      %c0_10 = arith.constant 0 : index
      %c0_11 = arith.constant 0 : index
      %13 = vector.load %arg8[%c0_10, %c0_11] : memref<8x128xf32, #tpu.memory_space<vmem>>, vector<8x128xf32>
      tpu.vector_store %arg8[%c0_10, %c0_11], %12 {strides = array<i32>} : memref<8x128xf32, #tpu.memory_space<vmem>>, vector<8x128xf32>,
    } else {
    }
    %c0 = arith.constant 0 : index
    %c0_1 = arith.constant 0 : index
    %3 = vector.load %arg8[%c0, %c0_1] : memref<8x128xf32, #tpu.memory_space<vmem>>, vector<8x128xf32>
    %c0_2 = arith.constant 0 : index
    %c0_3 = arith.constant 0 : index
    %4 = vector.load %arg2[%c0_2, %c0_3] : memref<8x512xbf16, #tpu.memory_space<vmem>>, vector<8x512xbf16>
    %c0_4 = arith.constant 0 : index
    %c0_5 = arith.constant 0 : index
    %5 = vector.load %arg3[%c0_4, %c0_5] : memref<512x128xbf16, #tpu.memory_space<vmem>>, vector<512x128xbf16>
    %cst = arith.constant dense<0.000000e+00> : vector<8x128xf32>
    %6 = tpu.matmul %4, %5, %cst {dimension_numbers = #tpu.dot_dimension_numbers<[1], [0], [0], [1], [0, 0, 1, 1], [], []>} : vector<8x512xbf16>, vector<512x128xbf16>, vector<8x128xf32> -> vector<8x128xf32>
    %7 = arith.addf %3, %6 : vector<8x128xf32>
    %c0_6 = arith.constant 0 : index
    %c0_7 = arith.constant 0 : index
    %8 = vector.load %arg8[%c0_6, %c0_7] : memref<8x128xf32, #tpu.memory_space<vmem>>, vector<8x128xf32>
    tpu.vector_store %arg8[%c0_6, %c0_7], %7 {strides = array<i32>} : memref<8x128xf32, #tpu.memory_space<vmem>>, vector<8x128xf32>,
    %c1_i32 = arith.constant 1 : i32
    %9 = arith.cmpi eq, %arg1, %c1_i32 : i32
    %10 = arith.extui %9 : i1 to i32
    %c0_i32_8 = arith.constant 0 : i32
    %11 = arith.cmpi ne, %10, %c0_i32_8 : i32
    scf.if %11 {
      %c0_9 = arith.constant 0 : index
      %c0_10 = arith.constant 0 : index
      %12 = vector.load %arg8[%c0_9, %c0_10] : memref<8x128xf32, #tpu.memory_space<vmem>>, vector<8x128xf32>
      %c0_11 = arith.constant 0 : index
      %c0_12 = arith.constant 0 : index
      %13 = vector.load %arg4[%c0_11, %c0_12] : memref<1x128xf32, #tpu.memory_space<vmem>>, vector<1x128xf32>
      %14 = vector.broadcast %13 : vector<1x128xf32> to vector<8x128xf32>
      %15 = arith.addf %12, %14 : vector<8x128xf32>
      %cst_13 = arith.constant 1.000000e-01 : f32
      %16 = vector.broadcast %cst_13 : f32 to vector<8x128xf32>
      %17 = arith.mulf %16, %15 : vector<8x128xf32>
      %18 = arith.maximumf %15, %17 : vector<8x128xf32>
      %19 = arith.truncf %18 : vector<8x128xf32> to vector<8x128xbf16>
      %c0_14 = arith.constant 0 : index
      %c0_15 = arith.constant 0 : index
      %20 = vector.load %arg5[%c0_14, %c0_15] : memref<128x1xbf16, #tpu.memory_space<vmem>>, vector<128x1xbf16>
      %cst_16 = arith.constant dense<0.000000e+00> : vector<8x1xf32>
      %21 = tpu.matmul %19, %20, %cst_16 {dimension_numbers = #tpu.dot_dimension_numbers<[1], [0], [0], [1], [0, 0, 1, 1], [], []>} : vector<8x128xbf16>, vector<128x1xbf16>, vector<8x1xf32> -> vector<8x1xf32>
      %c0_17 = arith.constant 0 : index
      %c0_18 = arith.constant 0 : index
      %22 = vector.load %arg6[%c0_17, %c0_18] : memref<1x1xf32, #tpu.memory_space<vmem>>, vector<1x1xf32>
      %23 = vector.broadcast %22 : vector<1x1xf32> to vector<8x1xf32>
      %24 = arith.addf %21, %23 : vector<8x1xf32>
      %c0_19 = arith.constant 0 : index
      %c0_20 = arith.constant 0 : index
      %25 = vector.load %arg7[%c0_19, %c0_20] : memref<8x1xf32, #tpu.memory_space<vmem>>, vector<8x1xf32>
      tpu.vector_store %arg7[%c0_19, %c0_20], %24 {strides = array<i32>} : memref<8x1xf32, #tpu.memory_space<vmem>>, vector<8x1xf32>,
    } else {
    }
    return
  }
  func.func @transform_0(%arg0: i32, %arg1: i32) -> (i32, i32) {
    %c0_i32 = arith.constant 0 : i32
    return %arg0, %arg1 : i32, i32
  }
  func.func @transform_1(%arg0: i32, %arg1: i32) -> (i32, i32) {
    %c0_i32 = arith.constant 0 : i32
    %c0_i32_0 = arith.constant 0 : i32
    return %arg1, %c0_i32 : i32, i32
  }
  func.func @transform_2(%arg0: i32, %arg1: i32) -> (i32, i32) {
    %c0_i32 = arith.constant 0 : i32
    %c0_i32_0 = arith.constant 0 : i32
    %c0_i32_1 = arith.constant 0 : i32
    return %c0_i32, %c0_i32_0 : i32, i32
  }
  func.func @transform_3(%arg0: i32, %arg1: i32) -> (i32, i32) {
    %c0_i32 = arith.constant 0 : i32
    %c0_i32_0 = arith.constant 0 : i32
    %c0_i32_1 = arith.constant 0 : i32
    return %c0_i32, %c0_i32_0 : i32, i32
  }
  func.func @transform_4(%arg0: i32, %arg1: i32) -> (i32, i32) {
    %c0_i32 = arith.constant 0 : i32
    %c0_i32_0 = arith.constant 0 : i32
    %c0_i32_1 = arith.constant 0 : i32
    return %c0_i32, %c0_i32_0 : i32, i32
  }
  func.func @transform_5(%arg0: i32, %arg1: i32) -> (i32, i32) {
    %c0_i32 = arith.constant 0 : i32
    %c0_i32_0 = arith.constant 0 : i32
    return %arg0, %c0_i32 : i32, i32
  }
}

module attributes {stable_mosaic.version = 11 : i64} {
  func.func @_mm_kernel(%arg0: i32, %arg1: i32, %arg2: memref<8x512xbf16, #tpu.memory_space<vmem>>, %arg3: memref<512x256xbf16, #tpu.memory_space<vmem>>, %arg4: memref<1x256xf32, #tpu.memory_space<vmem>>, %arg5: memref<8x256xbf16, #tpu.memory_space<vmem>>, %arg6: memref<8x256xf32, #tpu.memory_space<vmem>>) attributes {dimension_semantics = [#tpu.dimension_semantics<parallel>, #tpu.dimension_semantics<arbitrary>], iteration_bounds = array<i64: 1, 4>, scalar_prefetch = 0 : i64, scratch_operands = 1 : i64, tpu.core_type = #tpu.core_type<tc>, window_params = [{transform_indices = @transform_0, window_bounds = array<i64: 8, 512>}, {transform_indices = @transform_1, window_bounds = array<i64: 512, 256>}, {pipeline_mode = #tpu.pipeline_mode<synchronous>, transform_indices = @transform_2, window_bounds = array<i64: 1, 256>}, {transform_indices = @transform_3, window_bounds = array<i64: 8, 256>}]} {
    %c0_i32 = arith.constant 0 : i32
    %0 = arith.cmpi eq, %arg1, %c0_i32 : i32
    %1 = arith.extui %0 : i1 to i32
    %c0_i32_0 = arith.constant 0 : i32
    %2 = arith.cmpi ne, %1, %c0_i32_0 : i32
    scf.if %2 {
      %cst_9 = arith.constant 0.000000e+00 : f32
      %12 = vector.broadcast %cst_9 : f32 to vector<8x256xf32>
      %c0_10 = arith.constant 0 : index
      %c0_11 = arith.constant 0 : index
      %13 = vector.load %arg6[%c0_10, %c0_11] : memref<8x256xf32, #tpu.memory_space<vmem>>, vector<8x256xf32>
      tpu.vector_store %arg6[%c0_10, %c0_11], %12 {strides = array<i32>} : memref<8x256xf32, #tpu.memory_space<vmem>>, vector<8x256xf32>,
    } else {
    }
    %c0 = arith.constant 0 : index
    %c0_1 = arith.constant 0 : index
    %3 = vector.load %arg6[%c0, %c0_1] : memref<8x256xf32, #tpu.memory_space<vmem>>, vector<8x256xf32>
    %c0_2 = arith.constant 0 : index
    %c0_3 = arith.constant 0 : index
    %4 = vector.load %arg2[%c0_2, %c0_3] : memref<8x512xbf16, #tpu.memory_space<vmem>>, vector<8x512xbf16>
    %c0_4 = arith.constant 0 : index
    %c0_5 = arith.constant 0 : index
    %5 = vector.load %arg3[%c0_4, %c0_5] : memref<512x256xbf16, #tpu.memory_space<vmem>>, vector<512x256xbf16>
    %cst = arith.constant dense<0.000000e+00> : vector<8x256xf32>
    %6 = tpu.matmul %4, %5, %cst {dimension_numbers = #tpu.dot_dimension_numbers<[1], [0], [0], [1], [0, 0, 1, 1], [], []>} : vector<8x512xbf16>, vector<512x256xbf16>, vector<8x256xf32> -> vector<8x256xf32>
    %7 = arith.addf %3, %6 : vector<8x256xf32>
    %c0_6 = arith.constant 0 : index
    %c0_7 = arith.constant 0 : index
    %8 = vector.load %arg6[%c0_6, %c0_7] : memref<8x256xf32, #tpu.memory_space<vmem>>, vector<8x256xf32>
    tpu.vector_store %arg6[%c0_6, %c0_7], %7 {strides = array<i32>} : memref<8x256xf32, #tpu.memory_space<vmem>>, vector<8x256xf32>,
    %c3_i32 = arith.constant 3 : i32
    %9 = arith.cmpi eq, %arg1, %c3_i32 : i32
    %10 = arith.extui %9 : i1 to i32
    %c0_i32_8 = arith.constant 0 : i32
    %11 = arith.cmpi ne, %10, %c0_i32_8 : i32
    scf.if %11 {
      %c0_9 = arith.constant 0 : index
      %c0_10 = arith.constant 0 : index
      %12 = vector.load %arg6[%c0_9, %c0_10] : memref<8x256xf32, #tpu.memory_space<vmem>>, vector<8x256xf32>
      %c0_11 = arith.constant 0 : index
      %c0_12 = arith.constant 0 : index
      %13 = vector.load %arg4[%c0_11, %c0_12] : memref<1x256xf32, #tpu.memory_space<vmem>>, vector<1x256xf32>
      %14 = vector.broadcast %13 : vector<1x256xf32> to vector<8x256xf32>
      %15 = arith.addf %12, %14 : vector<8x256xf32>
      %cst_13 = arith.constant 1.000000e-01 : f32
      %16 = vector.broadcast %cst_13 : f32 to vector<8x256xf32>
      %17 = arith.mulf %16, %15 : vector<8x256xf32>
      %18 = arith.maximumf %15, %17 : vector<8x256xf32>
      %19 = arith.truncf %18 : vector<8x256xf32> to vector<8x256xbf16>
      %c0_14 = arith.constant 0 : index
      %c0_15 = arith.constant 0 : index
      %20 = vector.load %arg5[%c0_14, %c0_15] : memref<8x256xbf16, #tpu.memory_space<vmem>>, vector<8x256xbf16>
      tpu.vector_store %arg5[%c0_14, %c0_15], %19 {strides = array<i32>} : memref<8x256xbf16, #tpu.memory_space<vmem>>, vector<8x256xbf16>,
    } else {
    }
    return
  }
  func.func @transform_0(%arg0: i32, %arg1: i32) -> (i32, i32) {
    %c0_i32 = arith.constant 0 : i32
    return %arg0, %arg1 : i32, i32
  }
  func.func @transform_1(%arg0: i32, %arg1: i32) -> (i32, i32) {
    %c0_i32 = arith.constant 0 : i32
    %c0_i32_0 = arith.constant 0 : i32
    return %arg1, %c0_i32 : i32, i32
  }
  func.func @transform_2(%arg0: i32, %arg1: i32) -> (i32, i32) {
    %c0_i32 = arith.constant 0 : i32
    %c0_i32_0 = arith.constant 0 : i32
    %c0_i32_1 = arith.constant 0 : i32
    return %c0_i32, %c0_i32_0 : i32, i32
  }
  func.func @transform_3(%arg0: i32, %arg1: i32) -> (i32, i32) {
    %c0_i32 = arith.constant 0 : i32
    %c0_i32_0 = arith.constant 0 : i32
    return %arg0, %c0_i32 : i32, i32
  }
}

</mosaic_0001>

<bundles_post_ra>
// kernel: discriminator_forward.4
= control target key start
LH: loop header
LB: loop body
LE: loop exit
PB: predicated region body
PF: predicated region fallthrough
CT: control target
= control target key end

     0   :  { %vm19_vm0 = vcmask 523264   ;;  %v549_v1 = vmov 0.0   ;;  %vm132_vm1 = vcmask 392192   ;;  %vm425_vm2 = vcmask 519168   ;;  %s728_s1 = inlined_call_operand.vmem [shape: bf16[48,64], index: 1, kind: input, shape index: {}]   ;;  %s729_s0 = inlined_call_operand.vmem [shape: bf16[128,48], index: 0, kind: input, shape index: {}]   ;;  %s730_s2 = inlined_call_operand.vmem [shape: f32[1,64], index: 2, kind: input, shape index: {}]   ;;  %s731_s3 = inlined_call_operand.vmem [shape: bf16[128,64], index: 3, kind: output, shape index: {}]  }
   0x1   :  { %v538_v0 = vld [vmem:[%s728_s1] sm:$0xff]   ;;  %22 = vst.msk [vmem:[#allocation2 + $0x10] sm:$0xff] %vm19_vm0, %v549_v1  ;;  %20 = vst.msk [vmem:[#allocation2] sm:$0xff] %vm19_vm0, %v549_v1  ;;  %v539_v2 = vld [vmem:[%s728_s1 + $0x8] sm:$0xff]  }
   0x2   :  { %21 = vst.msk [vmem:[#allocation2 + $0x8] sm:$0xff] %vm19_vm0, %v549_v1  ;;  %23 = vst.msk [vmem:[#allocation2 + $0x18] sm:$0xff] %vm19_vm0, %v549_v1  ;;  %509 = vmatprep.subr.bf16.mxu0 %v538_v0  ;;  %531 = vmatprep.subr.bf16.mxu1 %v538_v0  ;;  %v540_v3 = vld [vmem:[%s728_s1 + $0x10] sm:$0xff]   ;;  %v541_v4 = vld [vmem:[%s729_s0] sm:$0xff]  }
   0x3   :  { %24 = vst.msk [vmem:[#allocation2 + $0x20] sm:$0xff] %vm19_vm0, %v549_v1  ;;  %25 = vst.msk [vmem:[#allocation2 + $0x28] sm:$0xff] %vm19_vm0, %v549_v1  ;;  %510 = vmatpush3.bf16.msra.mxu0 %v538_v0  ;;  %534 = vmatpush3.bf16.msra.mxu1 %v538_v0  ;;  %v542_v5 = vld [vmem:[%s729_s0 + $0x20] sm:$0xff]   ;;  %v543_v6 = vld [vmem:[%s729_s0 + $0x8] sm:$0xff]  }
   0x4   :  { %26 = vst.msk [vmem:[#allocation2 + $0x30] sm:$0xff] %vm19_vm0, %v549_v1  ;;  %27 = vst.msk [vmem:[#allocation2 + $0x38] sm:$0xff] %vm19_vm0, %v549_v1  ;;  %511 = vmatprep.subr.bf16.mxu0 %v539_v2  ;;  %532 = vmatprep.subr.bf16.mxu1 %v539_v2  ;;  %v544_v7 = vld [vmem:[%s729_s0 + $0x28] sm:$0xff]   ;;  %v545_v8 = vld [vmem:[%s729_s0 + $0x10] sm:$0xff]  }
   0x5   :  { %28 = vst.msk [vmem:[#allocation2 + $0x40] sm:$0xff] %vm19_vm0, %v549_v1  ;;  %29 = vst.msk [vmem:[#allocation2 + $0x48] sm:$0xff] %vm19_vm0, %v549_v1  ;;  %515 = vmatprep.mubr.msk.bf16.mxu0 %vm132_vm1, %v541_v4  ;;  %523 = vmatprep.mubr.msk.bf16.mxu1 %vm132_vm1, %v542_v5  ;;  %v546_v9 = vld [vmem:[%s729_s0 + $0x30] sm:$0xff]   ;;  %v547_v10 = vld [vmem:[%s729_s0 + $0x18] sm:$0xff]  }
   0x6   :  { %30 = vst.msk [vmem:[#allocation2 + $0x50] sm:$0xff] %vm19_vm0, %v549_v1  ;;  %31 = vst.msk [vmem:[#allocation2 + $0x58] sm:$0xff] %vm19_vm0, %v549_v1  ;;  %v548_v11 = vld [vmem:[%s729_s0 + $0x38] sm:$0xff]   ;;  %v638_v40 = vld [vmem:[%s730_s2] ss:$0 sm:$0xff] }
   0x7   :  { %32 = vst.msk [vmem:[#allocation2 + $0x60] sm:$0xff] %vm19_vm0, %v549_v1  ;;  %33 = vst.msk [vmem:[#allocation2 + $0x68] sm:$0xff] %vm19_vm0, %v549_v1  ;;  %512 = vmatpush3.bf16.msra.mxu0 %v539_v2  ;;  %535 = vmatpush3.bf16.msra.mxu1 %v539_v2 }
   0x8   :  { %34 = vst.msk [vmem:[#allocation2 + $0x70] sm:$0xff] %vm19_vm0, %v549_v1  ;;  %35 = vst.msk [vmem:[#allocation2 + $0x78] sm:$0xff] %vm19_vm0, %v549_v1  ;;  %513 = vmatprep.subr.bf16.mxu0 %v540_v3  ;;  %533 = vmatprep.subr.bf16.mxu1 %v540_v3  ;;  %v38_v12 = vld [vmem:[#allocation2 + $0x10] sm:$0xff]  ;;  %v36_v14 = vld [vmem:[#allocation2] sm:$0xff] }
   0x9   :  { %v39_v18 = vld [vmem:[#allocation2 + $0x18] sm:$0xff]  ;;  %v37_v24 = vld [vmem:[#allocation2 + $0x8] sm:$0xff] }
   0xa   :  { %v40_v38 = vld [vmem:[#allocation2 + $0x20] sm:$0xff]  ;;  %v41_v49 = vld [vmem:[#allocation2 + $0x28] sm:$0xff] }
   0xb   :  { %514 = vmatpush3.bf16.msra.mxu0 %v540_v3  ;;  %536 = vmatpush3.bf16.msra.mxu1 %v540_v3  ;;  %v42_v36 = vld [vmem:[#allocation2 + $0x30] sm:$0xff]  ;;  %v43_v43 = vld [vmem:[#allocation2 + $0x38] sm:$0xff] }
   0xc   :  { %v44_v15 = vld [vmem:[#allocation2 + $0x40] sm:$0xff]  ;;  %v45_v25 = vld [vmem:[#allocation2 + $0x48] sm:$0xff] }
   0xd   :  { %v46_v13 = vld [vmem:[#allocation2 + $0x50] sm:$0xff]  ;;  %v47_v19 = vld [vmem:[#allocation2 + $0x58] sm:$0xff] }
   0xe   :  { %516 = vmatmul.mubr.msk.bf16.vlgmr.msra.gmra.mrb[0].mxu0 %vm132_vm1, %v543_v6  ;;  %524 = vmatmul.mubr.msk.bf16.vlgmr.msra.gmra.mrb[0].mxu1 %vm132_vm1, %v544_v7  ;;  %v48_v39 = vld [vmem:[#allocation2 + $0x60] sm:$0xff]  ;;  %v49_v50 = vld [vmem:[#allocation2 + $0x68] sm:$0xff] }
   0xf   :  { %519 = vmatprep.mubr.msk.bf16.mxu0 %vm132_vm1, %v545_v8  ;;  %527 = vmatprep.mubr.msk.bf16.mxu1 %vm132_vm1, %v546_v9  ;;  %v50_v37 = vld [vmem:[#allocation2 + $0x70] sm:$0xff]  ;;  %v51_v44 = vld [vmem:[#allocation2 + $0x78] sm:$0xff] }
  0x16   :  { %520 = vmatmul.mubr.msk.bf16.gmra.mrb[4].mxu0 %vm132_vm1, %v547_v10  ;;  %528 = vmatmul.mubr.msk.bf16.gmra.mrb[4].mxu1 %vm132_vm1, %v548_v11 }
  0xe1   :  { %v517_v16 = vpop.f32.mrb[0].mxu0  ;;  %v525_v17 = vpop.f32.mrb[0].mxu1 }
  0xe2   :  { %v256_v20 = vadd.f32 %v517_v16, %v38_v12  ;;  %v264_v21 = vadd.f32 %v525_v17, %v46_v13  ;;  %v191_v22 = vpop.f32.mrb[1].mxu0  ;;  %v223_v23 = vpop.f32.mrb[1].mxu1 }
  0xe3   :  { %v254_v26 = vadd.f32 %v191_v22, %v36_v14  ;;  %v262_v27 = vadd.f32 %v223_v23, %v44_v15  ;;  %v518_v28 = vpop.f32.mrb[2].mxu0  ;;  %v526_v29 = vpop.f32.mrb[2].mxu1 }
  0xe4   :  { %273 = vst.msk [vmem:[#allocation2 + $0x10] sm:$0xff] %vm19_vm0, %v256_v20  ;;  %281 = vst.msk [vmem:[#allocation2 + $0x50] sm:$0xff] %vm19_vm0, %v264_v21  ;;  %v257_v30 = vadd.f32 %v518_v28, %v39_v18  ;;  %v265_v31 = vadd.f32 %v526_v29, %v47_v19  ;;  %v194_v32 = vpop.f32.mrb[3].mxu0  ;;  %v226_v33 = vpop.f32.mrb[3].mxu1 }
  0xe5   :  { %271 = vst.msk [vmem:[#allocation2] sm:$0xff] %vm19_vm0, %v254_v26  ;;  %279 = vst.msk [vmem:[#allocation2 + $0x40] sm:$0xff] %vm19_vm0, %v262_v27  ;;  %v255_v34 = vadd.f32 %v194_v32, %v37_v24  ;;  %v263_v35 = vadd.f32 %v226_v33, %v45_v25 }
  0xe6   :  { %274 = vst.msk [vmem:[#allocation2 + $0x18] sm:$0xff] %vm19_vm0, %v257_v30  ;;  %282 = vst.msk [vmem:[#allocation2 + $0x58] sm:$0xff] %vm19_vm0, %v265_v31 }
  0xe7   :  { %272 = vst.msk [vmem:[#allocation2 + $0x8] sm:$0xff] %vm19_vm0, %v255_v34  ;;  %280 = vst.msk [vmem:[#allocation2 + $0x48] sm:$0xff] %vm19_vm0, %v263_v35 }
  0xe9   :  { %v521_v41 = vpop.f32.mrb[4].mxu0  ;;  %v529_v42 = vpop.f32.mrb[4].mxu1 }
  0xea   :  { %v260_v45 = vadd.f32 %v521_v41, %v42_v36  ;;  %v268_v46 = vadd.f32 %v529_v42, %v50_v37  ;;  %v207_v47 = vpop.f32.mrb[5].mxu0  ;;  %v239_v48 = vpop.f32.mrb[5].mxu1 }
  0xeb   :  { %v292_v51 = vld [vmem:[#allocation2 + $0x10] sm:$0xff]  ;;  %v258_v53 = vadd.f32 %v207_v47, %v40_v38  ;;  %v266_v54 = vadd.f32 %v239_v48, %v48_v39  ;;  %v522_v55 = vpop.f32.mrb[6].mxu0  ;;  %v530_v56 = vpop.f32.mrb[6].mxu1 }
  0xec   :  { %v300_v52 = vld [vmem:[#allocation2 + $0x50] sm:$0xff]  ;;  %v315_v57 = vadd.f32 %v638_v40, %v292_v51  ;;  %v290_v59 = vld [vmem:[#allocation2] sm:$0xff]  ;;  %277 = vst.msk [vmem:[#allocation2 + $0x30] sm:$0xff] %vm19_vm0, %v260_v45  ;;  %285 = vst.msk [vmem:[#allocation2 + $0x70] sm:$0xff] %vm19_vm0, %v268_v46  ;;  %v261_v61 = vadd.f32 %v522_v55, %v43_v43  ;;  %v269_v62 = vadd.f32 %v530_v56, %v51_v44  ;;  %v210_v63 = vpop.f32.mrb[7].mxu0  ;;  %v242_v0 = vpop.f32.mrb[7].mxu1 }
  0xed   :  { %v323_v58 = vadd.f32 %v638_v40, %v300_v52  ;;  %v298_v60 = vld [vmem:[#allocation2 + $0x40] sm:$0xff]  ;;  %v313_v1 = vadd.f32 %v638_v40, %v290_v59  ;;  %v293_v3 = vld [vmem:[#allocation2 + $0x18] sm:$0xff]  ;;  %275 = vst.msk [vmem:[#allocation2 + $0x20] sm:$0xff] %vm19_vm0, %v258_v53  ;;  %283 = vst.msk [vmem:[#allocation2 + $0x60] sm:$0xff] %vm19_vm0, %v266_v54  ;;  %v259_v5 = vadd.f32 %v210_v63, %v41_v49 }
  0xee   :  { %v321_v2 = vadd.f32 %v638_v40, %v298_v60  ;;  %v301_v4 = vld [vmem:[#allocation2 + $0x58] sm:$0xff]  ;;  %v267_v6 = vadd.f32 %v242_v0, %v49_v50  ;;  %v331_v7 = vmul.f32 0.1, %v315_v57  ;;  %v316_v9 = vadd.f32 %v638_v40, %v293_v3  ;;  %v291_v11 = vld [vmem:[#allocation2 + $0x8] sm:$0xff]  ;;  %278 = vst.msk [vmem:[#allocation2 + $0x38] sm:$0xff] %vm19_vm0, %v261_v61  ;;  %286 = vst.msk [vmem:[#allocation2 + $0x78] sm:$0xff] %vm19_vm0, %v269_v62 }
  0xef   :  { %v339_v8 = vmul.f32 0.1, %v323_v58  ;;  %v324_v10 = vadd.f32 %v638_v40, %v301_v4  ;;  %v299_v12 = vld [vmem:[#allocation2 + $0x48] sm:$0xff]  ;;  %v329_v13 = vmul.f32 0.1, %v313_v1  ;;  %v314_v15 = vadd.f32 %v638_v40, %v291_v11  ;;  %276 = vst.msk [vmem:[#allocation2 + $0x28] sm:$0xff] %vm19_vm0, %v259_v5 }
  0xf0   :  { %v337_v14 = vmul.f32 0.1, %v321_v2  ;;  %v322_v16 = vadd.f32 %v638_v40, %v299_v12  ;;  %284 = vst.msk [vmem:[#allocation2 + $0x68] sm:$0xff] %vm19_vm0, %v267_v6  ;;  %v347_v17 = vmax.f32 %v315_v57, %v331_v7  ;;  %v332_v19 = vmul.f32 0.1, %v316_v9 }
  0xf1   :  { %v355_v18 = vmax.f32 %v323_v58, %v339_v8  ;;  %v340_v20 = vmul.f32 0.1, %v324_v10  ;;  %v345_v21 = vmax.f32 %v313_v1, %v329_v13  ;;  %v330_v23 = vmul.f32 0.1, %v314_v15 }
  0xf2   :  { %v353_v22 = vmax.f32 %v321_v2, %v337_v14  ;;  %v338_v24 = vmul.f32 0.1, %v322_v16  ;;  %v484_v25 = vpack.c.bf16 %v347_v17, %v347_v17  ;;  %v348_v27 = vmax.f32 %v316_v9, %v332_v19 }
  0xf3   :  { %v492_v26 = vpack.c.bf16 %v355_v18, %v355_v18  ;;  %v356_v28 = vmax.f32 %v324_v10, %v340_v20  ;;  %v482_v29 = vpack.c.bf16 %v345_v21, %v345_v21  ;;  %v346_v31 = vmax.f32 %v314_v15, %v330_v23  ;;  %v296_v33 = vld [vmem:[#allocation2 + $0x30] sm:$0xff] }
  0xf4   :  { %v490_v30 = vpack.c.bf16 %v353_v22, %v353_v22  ;;  %v354_v32 = vmax.f32 %v322_v16, %v338_v24  ;;  %v304_v34 = vld [vmem:[#allocation2 + $0x70] sm:$0xff]  ;;  %428 = vst.msk [vmem:[%s731_s3 + $0x8] sm:$0xf] %vm425_vm2, %v484_v25  ;;  %v485_v35 = vpack.c.bf16 %v348_v27, %v348_v27  ;;  %v319_v37 = vadd.f32 %v638_v40, %v296_v33  ;;  %v294_v39 = vld [vmem:[#allocation2 + $0x20] sm:$0xff] }
  0xf5   :  { %436 = vst.msk [vmem:[%s731_s3 + $0x28] sm:$0xf] %vm425_vm2, %v492_v26  ;;  %v493_v36 = vpack.c.bf16 %v356_v28, %v356_v28  ;;  %v327_v38 = vadd.f32 %v638_v40, %v304_v34  ;;  %v302_v41 = vld [vmem:[#allocation2 + $0x60] sm:$0xff]  ;;  %426 = vst.msk [vmem:[%s731_s3] sm:$0xf] %vm425_vm2, %v482_v29  ;;  %v483_v42 = vpack.c.bf16 %v346_v31, %v346_v31  ;;  %v297_v46 = vld [vmem:[#allocation2 + $0x38] sm:$0xff] }
  0xf6   :  { %434 = vst.msk [vmem:[%s731_s3 + $0x20] sm:$0xf] %vm425_vm2, %v490_v30  ;;  %v491_v43 = vpack.c.bf16 %v354_v32, %v354_v32  ;;  %v317_v44 = vadd.f32 %v638_v40, %v294_v39  ;;  %v325_v45 = vadd.f32 %v638_v40, %v302_v41  ;;  %v305_v47 = vld [vmem:[#allocation2 + $0x78] sm:$0xff]  ;;  %429 = vst.msk [vmem:[%s731_s3 + $0xc] sm:$0xf] %vm425_vm2, %v485_v35  ;;  %v295_v52 = vld [vmem:[#allocation2 + $0x28] sm:$0xff] }
  0xf7   :  { %437 = vst.msk [vmem:[%s731_s3 + $0x2c] sm:$0xf] %vm425_vm2, %v493_v36  ;;  %v335_v48 = vmul.f32 0.1, %v319_v37  ;;  %v343_v49 = vmul.f32 0.1, %v327_v38  ;;  %v320_v50 = vadd.f32 %v638_v40, %v297_v46  ;;  %v328_v51 = vadd.f32 %v638_v40, %v305_v47 }
  0xf8   :  { %v303_v53 = vld [vmem:[#allocation2 + $0x68] sm:$0xff]  ;;  %427 = vst.msk [vmem:[%s731_s3 + $0x4] sm:$0xf] %vm425_vm2, %v483_v42  ;;  %435 = vst.msk [vmem:[%s731_s3 + $0x24] sm:$0xf] %vm425_vm2, %v491_v43  ;;  %v318_v56 = vadd.f32 %v638_v40, %v295_v52 }
  0xf9   :  { %v333_v54 = vmul.f32 0.1, %v317_v44  ;;  %v341_v55 = vmul.f32 0.1, %v325_v45  ;;  %v326_v57 = vadd.f32 %v638_v40, %v303_v53  ;;  %v351_v58 = vmax.f32 %v319_v37, %v335_v48 }
  0xfa   :  { %v359_v59 = vmax.f32 %v327_v38, %v343_v49  ;;  %v336_v60 = vmul.f32 0.1, %v320_v50  ;;  %v344_v61 = vmul.f32 0.1, %v328_v51  ;;  %v334_v0 = vmul.f32 0.1, %v318_v56 }
  0xfb   :  { %v349_v62 = vmax.f32 %v317_v44, %v333_v54  ;;  %v357_v63 = vmax.f32 %v325_v45, %v341_v55  ;;  %v342_v1 = vmul.f32 0.1, %v326_v57  ;;  %v488_v2 = vpack.c.bf16 %v351_v58, %v351_v58 }
  0xfc   :  { %v496_v3 = vpack.c.bf16 %v359_v59, %v359_v59  ;;  %v352_v4 = vmax.f32 %v320_v50, %v336_v60  ;;  %v360_v5 = vmax.f32 %v328_v51, %v344_v61  ;;  %v350_v8 = vmax.f32 %v318_v56, %v334_v0 }
  0xfd   :  { %v486_v6 = vpack.c.bf16 %v349_v62, %v349_v62  ;;  %v494_v7 = vpack.c.bf16 %v357_v63, %v357_v63  ;;  %v358_v9 = vmax.f32 %v326_v57, %v342_v1  ;;  %432 = vst.msk [vmem:[%s731_s3 + $0x18] sm:$0xf] %vm425_vm2, %v488_v2 }
  0xfe   :  { %440 = vst.msk [vmem:[%s731_s3 + $0x38] sm:$0xf] %vm425_vm2, %v496_v3  ;;  %v489_v40 = vpack.c.bf16 %v352_v4, %v352_v4  ;;  %v497_v10 = vpack.c.bf16 %v360_v5, %v360_v5  ;;  %v487_v11 = vpack.c.bf16 %v350_v8, %v350_v8 }
  0xff   :  { %430 = vst.msk [vmem:[%s731_s3 + $0x10] sm:$0xf] %vm425_vm2, %v486_v6  ;;  %438 = vst.msk [vmem:[%s731_s3 + $0x30] sm:$0xf] %vm425_vm2, %v494_v7  ;;  %v495_v12 = vpack.c.bf16 %v358_v9, %v358_v9 }
 0x100   :  { %433 = vst.msk [vmem:[%s731_s3 + $0x1c] sm:$0xf] %vm425_vm2, %v489_v40  ;;  %441 = vst.msk [vmem:[%s731_s3 + $0x3c] sm:$0xf] %vm425_vm2, %v497_v10 }
 0x101   :  { %431 = vst.msk [vmem:[%s731_s3 + $0x14] sm:$0xf] %vm425_vm2, %v487_v11  ;;  %439 = vst.msk [vmem:[%s731_s3 + $0x34] sm:$0xf] %vm425_vm2, %v495_v12 }

// kernel: discriminator_forward.5
= control target key start
LH: loop header
LB: loop body
LE: loop exit
PB: predicated region body
PF: predicated region fallthrough
CT: control target
= control target key end

     0   :  { %s1079_s12 = smov 0   ;;  %s1081_s13 = smov 0   ;;  %s1199_s0 = inlined_call_operand.vmem [shape: bf16[32,1024], index: 0, kind: input, shape index: {}]   ;;  %s1200_s1 = inlined_call_operand.vmem [shape: bf16[1024,128], index: 1, kind: input, shape index: {}]   ;;  %s1201_s2 = inlined_call_operand.vmem [shape: f32[1,128], index: 2, kind: input, shape index: {}]   ;;  %s1202_s3 = inlined_call_operand.vmem [shape: bf16[32,128], index: 3, kind: output, shape index: {}]  }
   0x1   :  { %s1083_s14 = smov 0   ;;  %s1085_s15 = smov 0  }
   0x2   :  { %s1087_s16 = smov 0  }
   0x3 LB: > { %s22_s17 = sadd.s32 1, %s1052_s15  ;;  %p41_p1 = scmp.ne.s32.totalorder %s1044_s13, %s1040_s12  ;;  %s1056_s16 = sphi %s1087_s16, %s13_s16   ;;  %s1052_s15 = sphi %s1085_s15, %s1206_s15   ;;  %s1048_s14 = sphi %s1083_s14, %s1205_s14   ;;  %s1044_s13 = sphi %s1081_s13, %s1204_s13   ;;  %s1040_s12 = sphi %s1079_s12, %s1203_s12  }
   0x4   : > { %p23_p0 = scmp.ge.s32.totalorder %s22_s17, 2  ;;  %p42_p2 = scmp.eq.s32.totalorder %s1056_s16, 0 }
   0x5   : > { %s34_s19 = sadd.s32 1, %s1044_s13  ;;  %p802_p5 = scmp.ge.s32.totalorder %s1056_s16, 2 }
   0x6   : > { %s1208_s17 = smov (%p23_p0, %s22_s17), 0  ;;  %p43_p3 = por %p42_p2, %p41_p1 }
   0x7   : > { %s30_s18 = ssub.s32 %s1052_s15, %s1208_s17  ;;  %143 = sbr.rel (%p802_p5) target bundleno = 22 (0x16), region = 20 }
   0x8   : > { %p32_p4 = scmp.eq.s32.totalorder %s30_s18, 0 }
   0xa   : > { %s1114_s20 = scalar_select %p32_p4, %s1044_s13, %s34_s19  }
   0xe   : > { %146 = sbr.rel (!%p43_p3) target bundleno = 22 (0x16), region = 24  ;;  %s148_s21 = sand.u32 (%p43_p3), 1, %s1044_s13  }
   0xf   : > { %s861_s22 = sshll.u32 (%p43_p3), %s1052_s15, 4  ;;  %s803_s23 = sshll.u32 (%p43_p3), %s148_s21, 6 }
  0x10   : > { %s156_s26 = scalar_lea.vmem (%p43_p3), %s1199_s0, %s861_s22  ;;  %s150_s27 = scalar_lea.vmem (%p43_p3), [#allocation3], %s803_s23 }
  0x11   : > { %v169_v0 = vld [vmem:[%s156_s26] sm:$0xff] (%p43_p3)  ;;  %v171_v1 = vld [vmem:[%s156_s26 + $0x8] sm:$0xff] (%p43_p3) }
  0x12   : > { %v173_v2 = vld [vmem:[%s156_s26 + $0x20] sm:$0xff] (%p43_p3)  ;;  %170 = vst [vmem:[%s150_s27] sm:$0xff] (%p43_p3), %v169_v0  ;;  %172 = vst [vmem:[%s150_s27 + $0x8] sm:$0xff] (%p43_p3), %v171_v1  ;;  %v175_v3 = vld [vmem:[%s156_s26 + $0x28] sm:$0xff] (%p43_p3) }
  0x13   : > { %174 = vst [vmem:[%s150_s27 + $0x10] sm:$0xff] (%p43_p3), %v173_v2  ;;  %v177_v4 = vld [vmem:[%s156_s26 + $0x40] sm:$0xff] (%p43_p3)  ;;  %v179_v5 = vld [vmem:[%s156_s26 + $0x48] sm:$0xff] (%p43_p3)  ;;  %176 = vst [vmem:[%s150_s27 + $0x18] sm:$0xff] (%p43_p3), %v175_v3 }
  0x14   : > { %178 = vst [vmem:[%s150_s27 + $0x20] sm:$0xff] (%p43_p3), %v177_v4  ;;  %180 = vst [vmem:[%s150_s27 + $0x28] sm:$0xff] (%p43_p3), %v179_v5  ;;  %v181_v6 = vld [vmem:[%s156_s26 + $0x60] sm:$0xff] (%p43_p3)  ;;  %v183_v7 = vld [vmem:[%s156_s26 + $0x68] sm:$0xff] (%p43_p3) }
  0x15   : > { %182 = vst [vmem:[%s150_s27 + $0x30] sm:$0xff] %v181_v6  ;;  %184 = vst [vmem:[%s150_s27 + $0x38] sm:$0xff] %v183_v7 }
  0x16 PF: > { %p806_p6 = scmp.ge.s32.totalorder %s1056_s16, 1  ;;  %p198_p7 = scmp.lt.s32.totalorder %s1056_s16, 3 }
  0x18   : > { %p199_p8 = pnand %p806_p6, %p198_p7 }
  0x19   : > { %s205_s28 = sand.u32 (!%p199_p8), 1, %s1040_s12   ;;  %s808_s29 = sshll.u32 (!%p199_p8), %s1048_s14, 6 }
  0x1a   : > { %202 = sbr.rel (%p199_p8) target bundleno = 321 (0x141), region = 51  ;;  %s807_s30 = sshll.u32 (!%p199_p8), %s205_s28, 6 }
  0x1b   : > { %p236_p9 = scmp.lt.s32.totalorder (!%p199_p8), %s808_s29, 127  ;;  %s1131_s8 = scalar_lea.vmem (!%p199_p8), [#allocation3], %s807_s30 }
  0x1c   : > { %p810_p10 = scmp.ne.s32.totalorder (!%p199_p8), %s1048_s14, 0 }
  0x21   : > { %s1210_s29 = smov (!%p236_p9, %s808_s29), 127  ;;  %251 = sbr.rel (%p810_p10) target bundleno = 40 (0x28), region = 59 }
  0x22   : > { %s809_s4 = sshll.u32 %s1210_s29, 2  ;;  %v1058_v8 = vmov (!%p810_p10), 0.0  }
  0x23   : > { %s1129_s7 = scalar_lea.vmem %s1200_s1, %s809_s4  ;;  %252 = vst [vmem:[#allocation2] sm:$0xff] (!%p810_p10), %v1058_v8  ;;  %253 = vst [vmem:[#allocation2 + $0x8] sm:$0xff] (!%p810_p10), %v1058_v8 }
  0x24   : > { %254 = vst [vmem:[#allocation2 + $0x10] sm:$0xff] (!%p810_p10), %v1058_v8  ;;  %255 = vst [vmem:[#allocation2 + $0x18] sm:$0xff] (!%p810_p10), %v1058_v8 }
  0x28 PF: > { %v974_v9 = vld [vmem:[%s1129_s7 + $0x40] sm:$0xff]   ;;  %v978_v13 = vld [vmem:[%s1129_s7 + $0x48] sm:$0xff]   ;;  %v982_v17 = vld [vmem:[%s1129_s7 + $0x50] sm:$0xff]   ;;  %p851_p11 = scmp.ne.s32.totalorder %s1048_s14, 1 }
  0x29   : > { %v975_v10 = vld [vmem:[%s1129_s7 + $0xc0] sm:$0xff]   ;;  %877 = vmatprep.subr.bf16.mxu0 %v974_v9  ;;  %v979_v14 = vld [vmem:[%s1129_s7 + $0xc8] sm:$0xff]   ;;  %v983_v18 = vld [vmem:[%s1129_s7 + $0xd0] sm:$0xff]  }
  0x2a   : > { %v976_v11 = vld [vmem:[%s1129_s7] sm:$0xff]   ;;  %905 = vmatprep.subr.bf16.mxu1 %v975_v10  ;;  %v980_v15 = vld [vmem:[%s1129_s7 + $0x8] sm:$0xff]   ;;  %v984_v19 = vld [vmem:[%s1129_s7 + $0x10] sm:$0xff]  }
  0x2b   : > { %v977_v12 = vld [vmem:[%s1129_s7 + $0x80] sm:$0xff]   ;;  %878 = vmatpush3.bf16.msra.mxu0 %v976_v11  ;;  %v981_v16 = vld [vmem:[%s1129_s7 + $0x88] sm:$0xff]   ;;  %v985_v20 = vld [vmem:[%s1129_s7 + $0x90] sm:$0xff]  }
  0x2c   : > { %906 = vmatpush3.bf16.msra.mxu1 %v977_v12  ;;  %879 = vmatprep.subr.bf16.mxu0 %v978_v13  ;;  %v986_v21 = vld [vmem:[%s1129_s7 + $0x58] sm:$0xff]   ;;  %v990_v25 = vld [vmem:[%s1129_s7 + $0x60] sm:$0xff]   ;;  %v994_v29 = vld [vmem:[%s1129_s7 + $0x68] sm:$0xff]  }
  0x2d   : > { %907 = vmatprep.subr.bf16.mxu1 %v979_v14  ;;  %v987_v22 = vld [vmem:[%s1129_s7 + $0xd8] sm:$0xff]   ;;  %v991_v26 = vld [vmem:[%s1129_s7 + $0xe0] sm:$0xff]   ;;  %v995_v30 = vld [vmem:[%s1129_s7 + $0xe8] sm:$0xff]  }
  0x2e   : > { %v988_v23 = vld [vmem:[%s1129_s7 + $0x18] sm:$0xff]   ;;  %v992_v27 = vld [vmem:[%s1129_s7 + $0x20] sm:$0xff]   ;;  %v996_v31 = vld [vmem:[%s1129_s7 + $0x28] sm:$0xff]  }
  0x2f   : > { %880 = vmatpush3.bf16.msra.mxu0 %v980_v15  ;;  %v989_v24 = vld [vmem:[%s1129_s7 + $0x98] sm:$0xff]   ;;  %v993_v28 = vld [vmem:[%s1129_s7 + $0xa0] sm:$0xff]   ;;  %v997_v32 = vld [vmem:[%s1129_s7 + $0xa8] sm:$0xff]  }
  0x30   : > { %908 = vmatpush3.bf16.msra.mxu1 %v981_v16  ;;  %881 = vmatprep.subr.bf16.mxu0 %v982_v17  ;;  %v998_v33 = vld [vmem:[%s1129_s7 + $0x70] sm:$0xff]   ;;  %v1002_v37 = vld [vmem:[%s1129_s7 + $0x78] sm:$0xff]   ;;  %v256_v58 = vld [vmem:[#allocation2] sm:$0xff] }
  0x31   : > { %909 = vmatprep.subr.bf16.mxu1 %v983_v18  ;;  %v999_v34 = vld [vmem:[%s1129_s7 + $0xf0] sm:$0xff]   ;;  %v1003_v38 = vld [vmem:[%s1129_s7 + $0xf8] sm:$0xff]   ;;  %v257_v63 = vld [vmem:[#allocation2 + $0x8] sm:$0xff] }
  0x32   : > { %v1000_v35 = vld [vmem:[%s1129_s7 + $0x30] sm:$0xff]   ;;  %v1004_v39 = vld [vmem:[%s1129_s7 + $0x38] sm:$0xff]  }
  0x33   : > { %882 = vmatpush3.bf16.msra.mxu0 %v984_v19  ;;  %v1001_v36 = vld [vmem:[%s1129_s7 + $0xb0] sm:$0xff]   ;;  %v1005_v40 = vld [vmem:[%s1129_s7 + $0xb8] sm:$0xff]  }
  0x34   : > { %910 = vmatpush3.bf16.msra.mxu1 %v985_v20  ;;  %883 = vmatprep.subr.bf16.mxu0 %v986_v21  ;;  %v1006_v41 = vld [vmem:[%s1131_s8] ss:$16 sps:$4 sm:$0xff]   ;;  %v1008_v42 = vld [vmem:[%s1131_s8 + $0x4] ss:$16 sps:$4 sm:$0xff]   ;;  %v1009_v43 = vld [vmem:[%s1131_s8 + $0x8] ss:$16 sps:$4 sm:$0xff]  }
  0x35   : > { %911 = vmatprep.subr.bf16.mxu1 %v987_v22  ;;  %v1011_v44 = vld [vmem:[%s1131_s8 + $0xc] ss:$16 sps:$4 sm:$0xff]   ;;  %596 = vmatprep.mubr.bf16.mxu0 %v1008_v42  ;;  %v1012_v45 = vld [vmem:[%s1131_s8 + $0x24] ss:$16 sps:$4 sm:$0xff]   ;;  %v1016_v47 = vld [vmem:[%s1131_s8 + $0x20] ss:$16 sps:$4 sm:$0xff]  }
  0x36   : > { %645 = vmatprep.mubr.bf16.mxu1 %v1011_v44  ;;  %v1014_v46 = vld [vmem:[%s1131_s8 + $0x2c] ss:$16 sps:$4 sm:$0xff]   ;;  %v1017_v48 = vld [vmem:[%s1131_s8 + $0x28] ss:$16 sps:$4 sm:$0xff]   ;;  %v258_v12 = vld [vmem:[#allocation2 + $0x10] sm:$0xff] }
  0x37   : > { %884 = vmatpush3.bf16.msra.mxu0 %v988_v23  ;;  %v259_v17 = vld [vmem:[#allocation2 + $0x18] sm:$0xff]  ;;  %v852_v23 = vld [vmem:[%s1201_s2] ss:$0 sm:$0xff] (!%p851_p11) }
  0x38   : > { %912 = vmatpush3.bf16.msra.mxu1 %v989_v24  ;;  %885 = vmatprep.subr.bf16.mxu0 %v990_v25 }
  0x39   : > { %913 = vmatprep.subr.bf16.mxu1 %v991_v26 }
  0x3b   : > { %886 = vmatpush3.bf16.msra.mxu0 %v992_v27 }
  0x3c   : > { %914 = vmatpush3.bf16.msra.mxu1 %v993_v28  ;;  %887 = vmatprep.subr.bf16.mxu0 %v994_v29 }
  0x3d   : > { %915 = vmatprep.subr.bf16.mxu1 %v995_v30 }
  0x3f   : > { %888 = vmatpush3.bf16.msra.mxu0 %v996_v31 }
  0x40   : > { %916 = vmatpush3.bf16.msra.mxu1 %v997_v32  ;;  %889 = vmatprep.subr.bf16.mxu0 %v998_v33 }
  0x41   : > { %917 = vmatprep.subr.bf16.mxu1 %v999_v34 }
  0x43   : > { %890 = vmatpush3.bf16.msra.mxu0 %v1000_v35 }
  0x44   : > { %918 = vmatpush3.bf16.msra.mxu1 %v1001_v36  ;;  %891 = vmatprep.subr.bf16.mxu0 %v1002_v37 }
  0x45   : > { %919 = vmatprep.subr.bf16.mxu1 %v1003_v38 }
  0x47   : > { %892 = vmatpush3.bf16.msra.mxu0 %v1004_v39 }
  0x48   : > { %920 = vmatpush3.bf16.msra.mxu1 %v1005_v40 }
  0x4a   : > { %597 = vmatmul.mubr.bf16.vlgmr.msra.gmra.mrb[0].mxu0 %v1006_v41 }
  0x4b   : > { %646 = vmatmul.mubr.bf16.vlgmr.msra.gmra.mrb[0].mxu1 %v1009_v43  ;;  %604 = vmatprep.mubr.bf16.mxu0 %v1012_v45 }
  0x4c   : > { %653 = vmatprep.mubr.bf16.mxu1 %v1014_v46 }
  0x52   : > { %605 = vmatmul.mubr.bf16.gmra.mrb[4].mxu0 %v1016_v47 }
  0x53   : > { %654 = vmatmul.mubr.bf16.gmra.mrb[4].mxu1 %v1017_v48 }
 0x11d   : > { %v893_v49 = vpop.f32.mrb[0].mxu0 }
 0x11e   : > { %v921_v50 = vpop.f32.mrb[0].mxu1  ;;  %v894_v51 = vpop.f32.mrb[1].mxu0 }
 0x11f   : > { %v895_v52 = vadd.f32 %v894_v51, %v893_v49  ;;  %v922_v53 = vpop.f32.mrb[1].mxu1  ;;  %v896_v54 = vpop.f32.mrb[2].mxu0 }
 0x120   : > { %v923_v55 = vadd.f32 %v922_v53, %v921_v50  ;;  %v924_v56 = vpop.f32.mrb[2].mxu1  ;;  %v897_v57 = vpop.f32.mrb[3].mxu0 }
 0x121   : > { %v898_v59 = vadd.f32 %v897_v57, %v896_v54  ;;  %v925_v60 = vpop.f32.mrb[3].mxu1 }
 0x122   : > { %v648_v61 = vadd.f32 %v923_v55, %v895_v52  ;;  %v926_v62 = vadd.f32 %v925_v60, %v924_v56 }
 0x124   : > { %v662_v0 = vadd.f32 %v648_v61, %v256_v58  ;;  %v651_v1 = vadd.f32 %v926_v62, %v898_v59 }
 0x125   : > { %v899_v2 = vpop.f32.mrb[4].mxu0 }
 0x126   : > { %666 = vst [vmem:[#allocation2] sm:$0xff] %v662_v0  ;;  %v663_v3 = vadd.f32 %v651_v1, %v257_v63  ;;  %v927_v4 = vpop.f32.mrb[4].mxu1  ;;  %v900_v5 = vpop.f32.mrb[5].mxu0 }
 0x127   : > { %v901_v6 = vadd.f32 %v900_v5, %v899_v2  ;;  %v928_v7 = vpop.f32.mrb[5].mxu1  ;;  %v902_v8 = vpop.f32.mrb[6].mxu0 }
 0x128   : > { %667 = vst [vmem:[#allocation2 + $0x8] sm:$0xff] %v663_v3  ;;  %v929_v9 = vadd.f32 %v928_v7, %v927_v4  ;;  %v930_v10 = vpop.f32.mrb[6].mxu1  ;;  %v903_v11 = vpop.f32.mrb[7].mxu0 }
 0x129   : > { %v904_v13 = vadd.f32 %v903_v11, %v902_v8  ;;  %v931_v14 = vpop.f32.mrb[7].mxu1 }
 0x12a   : > { %v656_v15 = vadd.f32 %v929_v9, %v901_v6  ;;  %v932_v16 = vadd.f32 %v931_v14, %v930_v10  ;;  %673 = sbr.rel (%p851_p11) target bundleno = 321 (0x141), region = 63 }
 0x12c   : > { %v664_v18 = vadd.f32 %v656_v15, %v258_v12  ;;  %v659_v19 = vadd.f32 %v932_v16, %v904_v13 }
 0x12d   : > { %v674_v21 = vld [vmem:[#allocation2] sm:$0xff] (!%p851_p11) }
 0x12e   : > { %668 = vst [vmem:[#allocation2 + $0x10] sm:$0xff] %v664_v18  ;;  %v665_v20 = vadd.f32 %v659_v19, %v259_v17  ;;  %v685_v24 = vadd.f32 (!%p851_p11), %v852_v23, %v674_v21 }
 0x12f   : > { %v675_v22 = vld [vmem:[#allocation2 + $0x8] sm:$0xff] (!%p851_p11) }
 0x130   : > { %669 = vst [vmem:[#allocation2 + $0x18] sm:$0xff] %v665_v20  ;;  %v686_v25 = vadd.f32 (!%p851_p11), %v852_v23, %v675_v22  ;;  %v689_v30 = vmul.f32 (!%p851_p11), 0.1, %v685_v24 }
 0x132   : > { %v690_v31 = vmul.f32 0.1, %v686_v25  ;;  %v693_v34 = vmax.f32 %v685_v24, %v689_v30 }
 0x134   : > { %v694_v35 = vmax.f32 %v686_v25, %v690_v31 }
 0x135   : > { %v676_v26 = vld [vmem:[#allocation2 + $0x10] sm:$0xff] }
 0x136   : > { %v687_v28 = vadd.f32 %v852_v23, %v676_v26  ;;  %v869_v38 = vpack.c.bf16 %v694_v35, %v693_v34 }
 0x137   : > { %v677_v27 = vld [vmem:[#allocation2 + $0x18] sm:$0xff] }
 0x138   : > { %v688_v29 = vadd.f32 %v852_v23, %v677_v27  ;;  %v691_v32 = vmul.f32 0.1, %v687_v28  ;;  %870 = vst [vmem:[%s1202_s3] sm:$0xff] %v869_v38  }
 0x13a   : > { %v692_v33 = vmul.f32 0.1, %v688_v29  ;;  %v695_v36 = vmax.f32 %v687_v28, %v691_v32 }
 0x13c   : > { %v696_v37 = vmax.f32 %v688_v29, %v692_v33 }
 0x13e   : > { %v874_v39 = vpack.c.bf16 %v696_v37, %v695_v36 }
 0x140   : > { %876 = vst [vmem:[%s1202_s3 + $0x8] sm:$0xff] %v874_v39  }
 0x141 PF: > { %s13_s16 = sadd.s32 1, %s1056_s16   ;;  %s1203_s12 = smov %s1044_s13 }
 0x142   : > { %p10_p12 = scmp.ge.s32.totalorder %s13_s16, 4   ;;  %s1204_s13 = smov %s1114_s20 }
 0x143   : > { %s1205_s14 = smov %s1052_s15  ;;  %s1206_s15 = smov %s1208_s17 }
 0x144   :  { %12 = sbr.rel (!%p10_p12) target bundleno = 3 (0x3), region = 101 }

// kernel: discriminator_forward.7
= control target key start
LH: loop header
LB: loop body
LE: loop exit
PB: predicated region body
PF: predicated region fallthrough
CT: control target
= control target key end

     0   :  { %s1105_s20 = smov 0   ;;  %s1107_s21 = smov 0   ;;  %s1212_s0 = inlined_call_operand.vmem [shape: bf16[8,1024], index: 0, kind: input, shape index: {}]   ;;  %s1213_s1 = inlined_call_operand.vmem [shape: bf16[1024,128], index: 1, kind: input, shape index: {}]   ;;  %s1214_s2 = inlined_call_operand.vmem [shape: f32[1,128], index: 2, kind: input, shape index: {}]   ;;  %s1215_s3 = inlined_call_operand.vmem [shape: bf16[128,1], index: 3, kind: input, shape index: {}]   ;;  %s1216_s4 = inlined_call_operand.<no memory space> [shape: f32[1,1], index: 4, kind: input, shape index: {}]   ;;  %s1217_s5 = inlined_call_operand.vmem [shape: f32[8,1], index: 5, kind: output, shape index: {}]  }
   0x1   :  { %v10_v0 = vstv %s1216_s4  ;;  %s1109_s22 = smov 0  }
   0x2   :  { %11 = vst [vmem:[#allocation3] sm:$0x1] %v10_v0 }
   0x3 LB: > { %s26_s4 = sadd.s32 1, %s1063_s21  ;;  %p845_p0 = scmp.ge.s32.totalorder %s1067_s22, 1  ;;  %s1067_s22 = sphi %s1109_s22, %s17_s22   ;;  %s1063_s21 = sphi %s1107_s21, %s1219_s21   ;;  %s1059_s20 = sphi %s1105_s20, %s1218_s20  }
   0x4   : > { %p27_p1 = scmp.ge.s32.totalorder %s26_s4, 2  ;;  %p219_p2 = scmp.lt.s32.totalorder %s1067_s22, 3 }
   0x6   : > { %s1221_s4 = smov (%p27_p1, %s26_s4), 0  ;;  %p220_p3 = pnand %p845_p0, %p219_p2 }
   0x7   : > { %s846_s23 = sshll.u32 (!%p220_p3), %s1059_s20, 2  ;;  %s848_s24 = sshll.u32 (!%p220_p3), %s1059_s20, 6 }
   0x8   : > { %223 = sbr.rel (%p220_p3) target bundleno = 510 (0x1fe), region = 40  ;;  %p258_p4 = scmp.lt.s32.totalorder (!%p220_p3), %s846_s23, 7 }
   0x9   : > { %p266_p5 = scmp.lt.s32.totalorder (!%p220_p3), %s848_s24, 127  ;;  %p850_p6 = scmp.ne.s32.totalorder (!%p220_p3), %s1059_s20, 0 }
   0xf   : > { %s1223_s23 = smov (!%p258_p4, %s846_s23), 7  ;;  %s1225_s24 = smov (!%p266_p5, %s848_s24), 127 }
  0x10   : > { %s847_s25 = sshll.u32 %s1223_s23, 2  ;;  %s849_s29 = sshll.u32 %s1225_s24, 2  ;;  %v1069_v1 = vmov (!%p850_p6), 0.0  }
  0x11   : > { %s1130_s28 = scalar_lea.vmem %s1212_s0, %s847_s25  ;;  %s1135_s7 = scalar_lea.vmem %s1213_s1, %s849_s29  ;;  %280 = vst [vmem:[#allocation2] sm:$0xff] (!%p850_p6), %v1069_v1 }
  0x12   : > { %279 = sbr.rel (%p850_p6) target bundleno = 25 (0x19), region = 44 }
  0x19 PF: > { %v1001_v2 = vld [vmem:[%s1135_s7 + $0x40] sm:$0xff]   ;;  %v1005_v6 = vld [vmem:[%s1135_s7 + $0x48] sm:$0xff]   ;;  %v1009_v10 = vld [vmem:[%s1135_s7 + $0x50] sm:$0xff]   ;;  %p887_p7 = scmp.ne.s32.totalorder %s1059_s20, 1 }
  0x1a   : > { %v1002_v3 = vld [vmem:[%s1135_s7 + $0xc0] sm:$0xff]   ;;  %901 = vmatprep.subr.bf16.mxu0 %v1001_v2  ;;  %v1006_v7 = vld [vmem:[%s1135_s7 + $0xc8] sm:$0xff]   ;;  %v1010_v11 = vld [vmem:[%s1135_s7 + $0xd0] sm:$0xff]   ;;  %v1070_v54 = vmov (!%p887_p7), 0.0   ;;  %vm1071_vm0 = vmmov (!%p887_p7), 0   ;;  %vm763_vm1 = vcmask (!%p887_p7), 7168  }
  0x1b   : > { %v1003_v4 = vld [vmem:[%s1135_s7] sm:$0xff]   ;;  %923 = vmatprep.subr.bf16.mxu1 %v1002_v3  ;;  %v1007_v8 = vld [vmem:[%s1135_s7 + $0x8] sm:$0xff]   ;;  %v1011_v12 = vld [vmem:[%s1135_s7 + $0x10] sm:$0xff]  }
  0x1c   : > { %v1004_v5 = vld [vmem:[%s1135_s7 + $0x80] sm:$0xff]   ;;  %902 = vmatpush3.bf16.msra.mxu0 %v1003_v4  ;;  %v1008_v9 = vld [vmem:[%s1135_s7 + $0x88] sm:$0xff]   ;;  %v1012_v13 = vld [vmem:[%s1135_s7 + $0x90] sm:$0xff]  }
  0x1d   : > { %924 = vmatpush3.bf16.msra.mxu1 %v1004_v5  ;;  %903 = vmatprep.subr.bf16.mxu0 %v1005_v6  ;;  %v1013_v14 = vld [vmem:[%s1135_s7 + $0x58] sm:$0xff]   ;;  %v1017_v18 = vld [vmem:[%s1135_s7 + $0x60] sm:$0xff]   ;;  %v1021_v22 = vld [vmem:[%s1135_s7 + $0x68] sm:$0xff]  }
  0x1e   : > { %925 = vmatprep.subr.bf16.mxu1 %v1006_v7  ;;  %v1014_v15 = vld [vmem:[%s1135_s7 + $0xd8] sm:$0xff]   ;;  %v1018_v19 = vld [vmem:[%s1135_s7 + $0xe0] sm:$0xff]   ;;  %v1022_v23 = vld [vmem:[%s1135_s7 + $0xe8] sm:$0xff]  }
  0x1f   : > { %v1015_v16 = vld [vmem:[%s1135_s7 + $0x18] sm:$0xff]   ;;  %v1019_v20 = vld [vmem:[%s1135_s7 + $0x20] sm:$0xff]   ;;  %v1023_v24 = vld [vmem:[%s1135_s7 + $0x28] sm:$0xff]  }
  0x20   : > { %904 = vmatpush3.bf16.msra.mxu0 %v1007_v8  ;;  %v1016_v17 = vld [vmem:[%s1135_s7 + $0x98] sm:$0xff]   ;;  %v1020_v21 = vld [vmem:[%s1135_s7 + $0xa0] sm:$0xff]   ;;  %v1024_v25 = vld [vmem:[%s1135_s7 + $0xa8] sm:$0xff]  }
  0x21   : > { %926 = vmatpush3.bf16.msra.mxu1 %v1008_v9  ;;  %905 = vmatprep.subr.bf16.mxu0 %v1009_v10  ;;  %v1025_v26 = vld [vmem:[%s1135_s7 + $0x70] sm:$0xff]   ;;  %v1029_v30 = vld [vmem:[%s1135_s7 + $0x78] sm:$0xff]   ;;  %v282_v34 = vld [vmem:[%s1130_s28] sm:$0xff] }
  0x22   : > { %927 = vmatprep.subr.bf16.mxu1 %v1010_v11  ;;  %v1026_v27 = vld [vmem:[%s1135_s7 + $0xf0] sm:$0xff]   ;;  %v1030_v31 = vld [vmem:[%s1135_s7 + $0xf8] sm:$0xff]   ;;  %v283_v35 = vld [vmem:[%s1130_s28 + $0x8] sm:$0xff]  ;;  %v851_v36 = vcombine.low %v282_v34, %v282_v34  ;;  %v852_v37 = vcombine.high %v282_v34, %v282_v34 }
  0x23   : > { %v1027_v28 = vld [vmem:[%s1135_s7 + $0x30] sm:$0xff]   ;;  %v1031_v32 = vld [vmem:[%s1135_s7 + $0x38] sm:$0xff]   ;;  %v853_v38 = vcombine.low %v283_v35, %v283_v35  ;;  %v854_v39 = vcombine.high %v283_v35, %v283_v35  ;;  %v281_v48 = vld [vmem:[#allocation2] sm:$0xff] }
  0x24   : > { %906 = vmatpush3.bf16.msra.mxu0 %v1011_v12  ;;  %v1028_v29 = vld [vmem:[%s1135_s7 + $0xb0] sm:$0xff]   ;;  %v1032_v33 = vld [vmem:[%s1135_s7 + $0xb8] sm:$0xff]   ;;  %586 = vmatprep.mubr.bf16.mxu0 %v852_v37  ;;  %v1037_v53 = vld [vmem:[%s1215_s3] sm:$0xff] (!%p887_p7)  }
  0x25   : > { %928 = vmatpush3.bf16.msra.mxu1 %v1012_v13  ;;  %907 = vmatprep.subr.bf16.mxu0 %v1013_v14  ;;  %v1038_v55 = vld [vmem:[%s1215_s3 + $0x8] sm:$0xff] (!%p887_p7)   ;;  %v1039_v56 = vld [vmem:[%s1215_s3 + $0x10] sm:$0xff] (!%p887_p7)   ;;  %v1040_v57 = vld [vmem:[%s1215_s3 + $0x18] sm:$0xff] (!%p887_p7)  }
  0x26   : > { %929 = vmatprep.subr.bf16.mxu1 %v1014_v15  ;;  %626 = vmatprep.mubr.bf16.mxu1 %v854_v39  ;;  %v1041_v58 = vld [vmem:[%s1215_s3 + $0x20] sm:$0xff] (!%p887_p7)   ;;  %v1042_v62 = vld [vmem:[%s1215_s3 + $0x28] sm:$0xff] (!%p887_p7)   ;;  %v1043_v0 = vld [vmem:[%s1215_s3 + $0x30] sm:$0xff] (!%p887_p7)  }
  0x27   : > { %v888_v60 = vld [vmem:[%s1214_s2] ss:$0 sm:$0xff] (!%p887_p7)  ;;  %v1044_v2 = vld [vmem:[%s1215_s3 + $0x38] sm:$0xff] (!%p887_p7)   ;;  %v889_v4 = vld [vmem:[#allocation3] ss:$0 sm:$0xff] (!%p887_p7) }
  0x28   : > { %908 = vmatpush3.bf16.msra.mxu0 %v1015_v16 }
  0x29   : > { %930 = vmatpush3.bf16.msra.mxu1 %v1016_v17  ;;  %909 = vmatprep.subr.bf16.mxu0 %v1017_v18 }
  0x2a   : > { %931 = vmatprep.subr.bf16.mxu1 %v1018_v19 }
  0x2c   : > { %910 = vmatpush3.bf16.msra.mxu0 %v1019_v20 }
  0x2d   : > { %932 = vmatpush3.bf16.msra.mxu1 %v1020_v21  ;;  %911 = vmatprep.subr.bf16.mxu0 %v1021_v22 }
  0x2e   : > { %933 = vmatprep.subr.bf16.mxu1 %v1022_v23 }
  0x30   : > { %912 = vmatpush3.bf16.msra.mxu0 %v1023_v24 }
  0x31   : > { %934 = vmatpush3.bf16.msra.mxu1 %v1024_v25  ;;  %913 = vmatprep.subr.bf16.mxu0 %v1025_v26 }
  0x32   : > { %935 = vmatprep.subr.bf16.mxu1 %v1026_v27 }
  0x34   : > { %914 = vmatpush3.bf16.msra.mxu0 %v1027_v28 }
  0x35   : > { %936 = vmatpush3.bf16.msra.mxu1 %v1028_v29  ;;  %915 = vmatprep.subr.bf16.mxu0 %v1029_v30 }
  0x36   : > { %937 = vmatprep.subr.bf16.mxu1 %v1030_v31 }
  0x38   : > { %916 = vmatpush3.bf16.msra.mxu0 %v1031_v32 }
  0x39   : > { %938 = vmatpush3.bf16.msra.mxu1 %v1032_v33  ;;  %954 = vmatprep.subr.bf16.mxu0 (!%p887_p7), %v1070_v54 }
  0x3b   : > { %587 = vmatmul.mubr.bf16.vlgmr.msra.gmra.mrb[0].mxu0 %v851_v36 }
  0x3c   : > { %627 = vmatmul.mubr.bf16.vlgmr.msra.gmra.mrb[0].mxu1 %v853_v38  ;;  %955 = vmatpush3.bf16.msra.mxu0 (!%p887_p7), %v1037_v53 }
  0x3d   : > { %970 = vmatprep.mubr.msk.bf16.mxu0 (!%p887_p7), %vm1071_vm0, %v1070_v54  ;;  %956 = vmatprep.subr.bf16.mxu0 (!%p887_p7), %v1070_v54 }
  0x40   : > { %957 = vmatpush3.bf16.msra.mxu0 (!%p887_p7), %v1038_v55 }
  0x41   : > { %958 = vmatprep.subr.bf16.mxu0 (!%p887_p7), %v1070_v54 }
  0x44   : > { %959 = vmatpush3.bf16.msra.mxu0 (!%p887_p7), %v1039_v56 }
  0x45   : > { %960 = vmatprep.subr.bf16.mxu0 (!%p887_p7), %v1070_v54 }
  0x48   : > { %961 = vmatpush3.bf16.msra.mxu0 (!%p887_p7), %v1040_v57 }
  0x49   : > { %962 = vmatprep.subr.bf16.mxu0 (!%p887_p7), %v1070_v54 }
  0x4c   : > { %963 = vmatpush3.bf16.msra.mxu0 (!%p887_p7), %v1041_v58 }
  0x4d   : > { %964 = vmatprep.subr.bf16.mxu0 (!%p887_p7), %v1070_v54 }
  0x50   : > { %965 = vmatpush3.bf16.msra.mxu0 (!%p887_p7), %v1042_v62 }
  0x51   : > { %966 = vmatprep.subr.bf16.mxu0 (!%p887_p7), %v1070_v54 }
  0x54   : > { %967 = vmatpush3.bf16.msra.mxu0 (!%p887_p7), %v1043_v0 }
  0x55   : > { %968 = vmatprep.subr.bf16.mxu0 (!%p887_p7), %v1070_v54 }
  0x58   : > { %969 = vmatpush3.bf16.msra.mxu0 (!%p887_p7), %v1044_v2 }
 0x10e   : > { %v917_v40 = vpop.f32.mrb[0].mxu0 }
 0x10f   : > { %v939_v41 = vpop.f32.mrb[0].mxu1  ;;  %v918_v42 = vpop.f32.mrb[1].mxu0 }
 0x110   : > { %v940_v43 = vpop.f32.mrb[1].mxu1  ;;  %v919_v44 = vadd.f32 %v918_v42, %v917_v40  ;;  %v920_v46 = vpop.f32.mrb[2].mxu0 }
 0x111   : > { %v941_v45 = vadd.f32 %v940_v43, %v939_v41  ;;  %v942_v47 = vpop.f32.mrb[2].mxu1  ;;  %v921_v49 = vpop.f32.mrb[3].mxu0  ;;  %639 = sbr.rel (%p887_p7) target bundleno = 510 (0x1fe), region = 48 }
 0x112   : > { %v943_v50 = vpop.f32.mrb[3].mxu1 }
 0x113   : > { %v629_v51 = vadd.f32 %v941_v45, %v919_v44 }
 0x115   : > { %v634_v52 = vadd.f32 %v629_v51, %v281_v48 }
 0x117   : > { %635 = vst [vmem:[#allocation2] sm:$0xff] %v634_v52 }
 0x11e   : > { %v640_v59 = vld [vmem:[#allocation2] sm:$0xff] }
 0x11f   : > { %v648_v61 = vadd.f32 %v888_v60, %v640_v59 }
 0x121   : > { %v649_v63 = vmul.f32 0.1, %v648_v61 }
 0x123   : > { %v650_v1 = vmax.f32 %v648_v61, %v649_v63 }
 0x125   : > { %v651_v3 = vpack.c.bf16 %v650_v1, %v650_v1 }
 0x127   : > { %971 = vmatmul.mubr.bf16.vlgmr.msra.gmra.mrb[0].mxu0 %v651_v3 }
 0x1fa   : > { %v757_v5 = vpop.f32.mrb[0].mxu0 }
 0x1fb   : > { %v758_v6 = vadd.f32 %v889_v4, %v757_v5  ;;  %v972_v7 = vpop.f32.mrb[1].mxu0 }
 0x1fc   : > { %v760_v8 = vpop.f32.mrb[2].mxu0 }
 0x1fd   : > { %764 = vst.msk [vmem:[%s1217_s5] sm:$0xff] %vm763_vm1, %v758_v6  ;;  %v973_v9 = vpop.f32.mrb[3].mxu0 }
 0x1fe PF: > { %s17_s22 = sadd.s32 1, %s1067_s22   ;;  %s1218_s20 = smov %s1063_s21 }
 0x1ff   : > { %p14_p8 = scmp.ge.s32.totalorder %s17_s22, 4   ;;  %s1219_s21 = smov %s1221_s4 }
 0x201   :  { %16 = sbr.rel (!%p14_p8) target bundleno = 3 (0x3), region = 81 }

// kernel: discriminator_forward.6
= control target key start
LH: loop header
LB: loop body
LE: loop exit
PB: predicated region body
PF: predicated region fallthrough
CT: control target
= control target key end

     0   :  { %s1085_s12 = smov 0   ;;  %s1087_s13 = smov 0   ;;  %s1200_s0 = inlined_call_operand.vmem [shape: bf16[8,2048], index: 0, kind: input, shape index: {}]   ;;  %s1201_s1 = inlined_call_operand.vmem [shape: bf16[2048,256], index: 1, kind: input, shape index: {}]   ;;  %s1202_s2 = inlined_call_operand.vmem [shape: f32[1,256], index: 2, kind: input, shape index: {}]   ;;  %s1203_s3 = inlined_call_operand.vmem [shape: bf16[8,256], index: 3, kind: output, shape index: {}]  }
   0x1   :  { %s1089_s14 = smov 0  }
   0x2 LB: > { %s22_s15 = sadd.s32 1, %s1058_s13  ;;  %p833_p0 = scmp.ge.s32.totalorder %s1062_s14, 1  ;;  %s1062_s14 = sphi %s1089_s14, %s13_s14   ;;  %s1058_s13 = sphi %s1087_s13, %s1205_s13   ;;  %s1054_s12 = sphi %s1085_s12, %s1204_s12  }
   0x3   : > { %p23_p1 = scmp.ge.s32.totalorder %s22_s15, 4  ;;  %p168_p2 = scmp.lt.s32.totalorder %s1062_s14, 5 }
   0x5   : > { %s1207_s15 = smov (%p23_p1, %s22_s15), 0  ;;  %p169_p3 = pnand %p833_p0, %p168_p2 }
   0x6   : > { %s834_s16 = sshll.u32 (!%p169_p3), %s1054_s12, 2  ;;  %s836_s17 = sshll.u32 (!%p169_p3), %s1054_s12, 6 }
   0x7   : > { %172 = sbr.rel (%p169_p3) target bundleno = 324 (0x144), region = 32  ;;  %p205_p4 = scmp.lt.s32.totalorder (!%p169_p3), %s834_s16, 15 }
   0x8   : > { %p213_p5 = scmp.lt.s32.totalorder (!%p169_p3), %s836_s17, 255  ;;  %p839_p6 = scmp.ne.s32.totalorder (!%p169_p3), %s1054_s12, 0 }
   0xe   : > { %s1209_s16 = smov (!%p205_p4, %s834_s16), 15  ;;  %s1211_s17 = smov (!%p213_p5, %s836_s17), 255 }
   0xf   : > { %s835_s18 = sshll.u32 %s1209_s16, 2  ;;  %s913_s22 = sshll.u32 %s1211_s17, 3  ;;  %v1064_v0 = vmov (!%p839_p6), 0.0  }
  0x10   : > { %s1110_s21 = scalar_lea.vmem %s1200_s0, %s835_s18  ;;  %s1115_s25 = scalar_lea.vmem %s1201_s1, %s913_s22  ;;  %228 = vst [vmem:[#allocation2] sm:$0xff] (!%p839_p6), %v1064_v0  ;;  %229 = vst [vmem:[#allocation2 + $0x8] sm:$0xff] (!%p839_p6), %v1064_v0 }
  0x11   : > { %227 = sbr.rel (%p839_p6) target bundleno = 24 (0x18), region = 36 }
  0x18 PF: > { %v940_v1 = vld [vmem:[%s1115_s25 + $0x4] ss:$8 sps:$4 sm:$0xff]   ;;  %v944_v3 = vld [vmem:[%s1115_s25] ss:$8 sps:$4 sm:$0xff]   ;;  %v946_v5 = vld [vmem:[%s1115_s25 + $0x14] ss:$8 sps:$4 sm:$0xff]  }
  0x19   : > { %v942_v2 = vld [vmem:[%s1115_s25 + $0x104] ss:$8 sps:$4 sm:$0xff]   ;;  %632 = vmatprep.subr.bf16.mxu0 %v940_v1  ;;  %v945_v4 = vld [vmem:[%s1115_s25 + $0x100] ss:$8 sps:$4 sm:$0xff]   ;;  %v948_v6 = vld [vmem:[%s1115_s25 + $0x114] ss:$8 sps:$4 sm:$0xff]  }
  0x1a   : > { %673 = vmatprep.subr.bf16.mxu1 %v942_v2  ;;  %633 = vmatpush1.bf16.msra.mxu0 %v944_v3  ;;  %v950_v7 = vld [vmem:[%s1115_s25 + $0x10] ss:$8 sps:$4 sm:$0xff]   ;;  %v952_v9 = vld [vmem:[%s1115_s25 + $0x24] ss:$8 sps:$4 sm:$0xff]   ;;  %v956_v11 = vld [vmem:[%s1115_s25 + $0x20] ss:$8 sps:$4 sm:$0xff]  }
  0x1b   : > { %674 = vmatpush1.bf16.msra.mxu1 %v945_v4  ;;  %634 = vmatprep.subr.bf16.mxu0 %v946_v5  ;;  %v951_v8 = vld [vmem:[%s1115_s25 + $0x110] ss:$8 sps:$4 sm:$0xff]   ;;  %v954_v10 = vld [vmem:[%s1115_s25 + $0x124] ss:$8 sps:$4 sm:$0xff]   ;;  %v957_v12 = vld [vmem:[%s1115_s25 + $0x120] ss:$8 sps:$4 sm:$0xff]  }
  0x1c   : > { %675 = vmatprep.subr.bf16.mxu1 %v948_v6  ;;  %v958_v13 = vld [vmem:[%s1115_s25 + $0x34] ss:$8 sps:$4 sm:$0xff]   ;;  %v962_v15 = vld [vmem:[%s1115_s25 + $0x30] ss:$8 sps:$4 sm:$0xff]   ;;  %v964_v17 = vld [vmem:[%s1115_s25 + $0x44] ss:$8 sps:$4 sm:$0xff]  }
  0x1d   : > { %v960_v14 = vld [vmem:[%s1115_s25 + $0x134] ss:$8 sps:$4 sm:$0xff]   ;;  %v963_v16 = vld [vmem:[%s1115_s25 + $0x130] ss:$8 sps:$4 sm:$0xff]   ;;  %v966_v18 = vld [vmem:[%s1115_s25 + $0x144] ss:$8 sps:$4 sm:$0xff]  }
  0x1e   : > { %635 = vmatpush1.bf16.msra.mxu0 %v950_v7  ;;  %v968_v19 = vld [vmem:[%s1115_s25 + $0x40] ss:$8 sps:$4 sm:$0xff]   ;;  %v970_v21 = vld [vmem:[%s1115_s25 + $0x54] ss:$8 sps:$4 sm:$0xff]   ;;  %v974_v23 = vld [vmem:[%s1115_s25 + $0x50] ss:$8 sps:$4 sm:$0xff]  }
  0x1f   : > { %676 = vmatpush1.bf16.msra.mxu1 %v951_v8  ;;  %636 = vmatprep.subr.bf16.mxu0 %v952_v9  ;;  %v969_v20 = vld [vmem:[%s1115_s25 + $0x140] ss:$8 sps:$4 sm:$0xff]   ;;  %v972_v22 = vld [vmem:[%s1115_s25 + $0x154] ss:$8 sps:$4 sm:$0xff]   ;;  %v975_v24 = vld [vmem:[%s1115_s25 + $0x150] ss:$8 sps:$4 sm:$0xff]  }
  0x20   : > { %677 = vmatprep.subr.bf16.mxu1 %v954_v10  ;;  %v976_v25 = vld [vmem:[%s1115_s25 + $0x64] ss:$8 sps:$4 sm:$0xff]   ;;  %v980_v27 = vld [vmem:[%s1115_s25 + $0x60] ss:$8 sps:$4 sm:$0xff]   ;;  %v982_v29 = vld [vmem:[%s1115_s25 + $0x74] ss:$8 sps:$4 sm:$0xff]  }
  0x21   : > { %v978_v26 = vld [vmem:[%s1115_s25 + $0x164] ss:$8 sps:$4 sm:$0xff]   ;;  %v981_v28 = vld [vmem:[%s1115_s25 + $0x160] ss:$8 sps:$4 sm:$0xff]   ;;  %v984_v30 = vld [vmem:[%s1115_s25 + $0x174] ss:$8 sps:$4 sm:$0xff]  }
  0x22   : > { %637 = vmatpush1.bf16.msra.mxu0 %v956_v11  ;;  %v986_v31 = vld [vmem:[%s1115_s25 + $0x70] ss:$8 sps:$4 sm:$0xff]   ;;  %v988_v33 = vld [vmem:[%s1115_s25 + $0x84] ss:$8 sps:$4 sm:$0xff]   ;;  %v992_v35 = vld [vmem:[%s1115_s25 + $0x80] ss:$8 sps:$4 sm:$0xff]  }
  0x23   : > { %678 = vmatpush1.bf16.msra.mxu1 %v957_v12  ;;  %638 = vmatprep.subr.bf16.mxu0 %v958_v13  ;;  %v987_v32 = vld [vmem:[%s1115_s25 + $0x170] ss:$8 sps:$4 sm:$0xff]   ;;  %v990_v34 = vld [vmem:[%s1115_s25 + $0x184] ss:$8 sps:$4 sm:$0xff]   ;;  %v993_v36 = vld [vmem:[%s1115_s25 + $0x180] ss:$8 sps:$4 sm:$0xff]  }
  0x24   : > { %679 = vmatprep.subr.bf16.mxu1 %v960_v14  ;;  %v994_v37 = vld [vmem:[%s1115_s25 + $0x94] ss:$8 sps:$4 sm:$0xff]   ;;  %v998_v39 = vld [vmem:[%s1115_s25 + $0x90] ss:$8 sps:$4 sm:$0xff]   ;;  %v1000_v41 = vld [vmem:[%s1115_s25 + $0xa4] ss:$8 sps:$4 sm:$0xff]  }
  0x25   : > { %v996_v38 = vld [vmem:[%s1115_s25 + $0x194] ss:$8 sps:$4 sm:$0xff]   ;;  %v999_v40 = vld [vmem:[%s1115_s25 + $0x190] ss:$8 sps:$4 sm:$0xff]   ;;  %v1002_v42 = vld [vmem:[%s1115_s25 + $0x1a4] ss:$8 sps:$4 sm:$0xff]  }
  0x26   : > { %639 = vmatpush1.bf16.msra.mxu0 %v962_v15  ;;  %v1004_v43 = vld [vmem:[%s1115_s25 + $0xa0] ss:$8 sps:$4 sm:$0xff]   ;;  %v1006_v45 = vld [vmem:[%s1115_s25 + $0xb4] ss:$8 sps:$4 sm:$0xff]   ;;  %v1010_v50 = vld [vmem:[%s1115_s25 + $0xb0] ss:$8 sps:$4 sm:$0xff]  }
  0x27   : > { %680 = vmatpush1.bf16.msra.mxu1 %v963_v16  ;;  %640 = vmatprep.subr.bf16.mxu0 %v964_v17  ;;  %v1005_v44 = vld [vmem:[%s1115_s25 + $0x1a0] ss:$8 sps:$4 sm:$0xff]   ;;  %v1008_v46 = vld [vmem:[%s1115_s25 + $0x1b4] ss:$8 sps:$4 sm:$0xff]   ;;  %v1011_v51 = vld [vmem:[%s1115_s25 + $0x1b0] ss:$8 sps:$4 sm:$0xff]  }
  0x28   : > { %681 = vmatprep.subr.bf16.mxu1 %v966_v18  ;;  %v232_v47 = vld [vmem:[%s1110_s21] sm:$0xff]  ;;  %v233_v49 = vld [vmem:[%s1110_s21 + $0x8] sm:$0xff]  ;;  %v1018_v57 = vld [vmem:[%s1115_s25 + $0xd4] ss:$8 sps:$4 sm:$0xff]   ;;  %p908_p7 = scmp.ne.s32.totalorder %s1054_s12, 3 }
  0x29   : > { %v841_v48 = vcombine.high %v232_v47, %v232_v47  ;;  %v843_v52 = vcombine.high %v233_v49, %v233_v49  ;;  %v1012_v53 = vld [vmem:[%s1115_s25 + $0xc4] ss:$8 sps:$4 sm:$0xff]   ;;  %v1016_v55 = vld [vmem:[%s1115_s25 + $0xc0] ss:$8 sps:$4 sm:$0xff]   ;;  %v1020_v58 = vld [vmem:[%s1115_s25 + $0x1d4] ss:$8 sps:$4 sm:$0xff]   ;;  %v840_v5 = vcombine.low %v232_v47, %v232_v47  ;;  %v842_v6 = vcombine.low %v233_v49, %v233_v49 }
  0x2a   : > { %641 = vmatpush1.bf16.msra.mxu0 %v968_v19  ;;  %v1014_v54 = vld [vmem:[%s1115_s25 + $0x1c4] ss:$8 sps:$4 sm:$0xff]   ;;  %v1017_v56 = vld [vmem:[%s1115_s25 + $0x1c0] ss:$8 sps:$4 sm:$0xff]   ;;  %v1022_v59 = vld [vmem:[%s1115_s25 + $0xd0] ss:$8 sps:$4 sm:$0xff]  }
  0x2b   : > { %682 = vmatpush1.bf16.msra.mxu1 %v969_v20  ;;  %642 = vmatprep.subr.bf16.mxu0 %v970_v21  ;;  %v1023_v60 = vld [vmem:[%s1115_s25 + $0x1d0] ss:$8 sps:$4 sm:$0xff]   ;;  %v1024_v61 = vld [vmem:[%s1115_s25 + $0xe4] ss:$8 sps:$4 sm:$0xff]   ;;  %v1028_v63 = vld [vmem:[%s1115_s25 + $0xe0] ss:$8 sps:$4 sm:$0xff]   ;;  %v726_v21 = vlaneseq (!%p908_p7) }
  0x2c   : > { %683 = vmatprep.subr.bf16.mxu1 %v972_v22  ;;  %664 = vmatprep.mubr.bf16.mxu0 %v841_v48  ;;  %v1026_v62 = vld [vmem:[%s1115_s25 + $0x1e4] ss:$8 sps:$4 sm:$0xff]   ;;  %v1029_v0 = vld [vmem:[%s1115_s25 + $0x1e0] ss:$8 sps:$4 sm:$0xff]   ;;  %v1030_v1 = vld [vmem:[%s1115_s25 + $0xf4] ss:$8 sps:$4 sm:$0xff]  }
  0x2d   : > { %705 = vmatprep.mubr.bf16.mxu1 %v843_v52  ;;  %v1032_v2 = vld [vmem:[%s1115_s25 + $0x1f4] ss:$8 sps:$4 sm:$0xff]   ;;  %v1034_v3 = vld [vmem:[%s1115_s25 + $0xf0] ss:$8 sps:$4 sm:$0xff]   ;;  %v230_v8 = vld [vmem:[#allocation2] sm:$0xff]  ;;  %v727_v22 = vshrl.u32 (!%p908_p7), %v726_v21, 7 }
  0x2e   : > { %643 = vmatpush1.bf16.msra.mxu0 %v974_v23  ;;  %v1035_v4 = vld [vmem:[%s1115_s25 + $0x1f0] ss:$8 sps:$4 sm:$0xff]   ;;  %v231_v12 = vld [vmem:[#allocation2 + $0x8] sm:$0xff]  ;;  %v724_v23 = vld [vmem:[%s1202_s2] sm:$0x3] (!%p908_p7) }
  0x2f   : > { %684 = vmatpush1.bf16.msra.mxu1 %v975_v24  ;;  %644 = vmatprep.subr.bf16.mxu0 %v976_v25  ;;  %v728_v24 = vsub.s32 (!%p908_p7), 0, %v727_v22  ;;  %v732_v25 = vsub.s32 (!%p908_p7), 1, %v727_v22 }
  0x30   : > { %685 = vmatprep.subr.bf16.mxu1 %v978_v26 }
  0x32   : > { %645 = vmatpush1.bf16.msra.mxu0 %v980_v27 }
  0x33   : > { %686 = vmatpush1.bf16.msra.mxu1 %v981_v28  ;;  %646 = vmatprep.subr.bf16.mxu0 %v982_v29  ;;  %v729_v28 = vrot.slane (!%p908_p7), %v724_v23, %v728_v24  ;;  %v733_v29 = vrot.slane (!%p908_p7), %v724_v23, %v732_v25 }
  0x34   : > { %687 = vmatprep.subr.bf16.mxu1 %v984_v30 }
  0x36   : > { %647 = vmatpush1.bf16.msra.mxu0 %v986_v31 }
  0x37   : > { %688 = vmatpush1.bf16.msra.mxu1 %v987_v32  ;;  %648 = vmatprep.subr.bf16.mxu0 %v988_v33 }
  0x38   : > { %689 = vmatprep.subr.bf16.mxu1 %v990_v34 }
  0x3a   : > { %649 = vmatpush1.bf16.msra.mxu0 %v992_v35 }
  0x3b   : > { %690 = vmatpush1.bf16.msra.mxu1 %v993_v36  ;;  %650 = vmatprep.subr.bf16.mxu0 %v994_v37 }
  0x3c   : > { %691 = vmatprep.subr.bf16.mxu1 %v996_v38 }
  0x3e   : > { %651 = vmatpush1.bf16.msra.mxu0 %v998_v39 }
  0x3f   : > { %692 = vmatpush1.bf16.msra.mxu1 %v999_v40  ;;  %652 = vmatprep.subr.bf16.mxu0 %v1000_v41 }
  0x40   : > { %693 = vmatprep.subr.bf16.mxu1 %v1002_v42 }
  0x42   : > { %653 = vmatpush1.bf16.msra.mxu0 %v1004_v43 }
  0x43   : > { %694 = vmatpush1.bf16.msra.mxu1 %v1005_v44  ;;  %654 = vmatprep.subr.bf16.mxu0 %v1006_v45 }
  0x44   : > { %695 = vmatprep.subr.bf16.mxu1 %v1008_v46 }
  0x46   : > { %655 = vmatpush1.bf16.msra.mxu0 %v1010_v50 }
  0x47   : > { %696 = vmatpush1.bf16.msra.mxu1 %v1011_v51  ;;  %656 = vmatprep.subr.bf16.mxu0 %v1012_v53 }
  0x48   : > { %697 = vmatprep.subr.bf16.mxu1 %v1014_v54 }
  0x4a   : > { %657 = vmatpush1.bf16.msra.mxu0 %v1016_v55 }
  0x4b   : > { %698 = vmatpush1.bf16.msra.mxu1 %v1017_v56  ;;  %658 = vmatprep.subr.bf16.mxu0 %v1018_v57 }
  0x4c   : > { %699 = vmatprep.subr.bf16.mxu1 %v1020_v58 }
  0x4e   : > { %659 = vmatpush1.bf16.msra.mxu0 %v1022_v59 }
  0x4f   : > { %700 = vmatpush1.bf16.msra.mxu1 %v1023_v60  ;;  %660 = vmatprep.subr.bf16.mxu0 %v1024_v61 }
  0x50   : > { %701 = vmatprep.subr.bf16.mxu1 %v1026_v62 }
  0x52   : > { %661 = vmatpush1.bf16.msra.mxu0 %v1028_v63 }
  0x53   : > { %702 = vmatpush1.bf16.msra.mxu1 %v1029_v0  ;;  %662 = vmatprep.subr.bf16.mxu0 %v1030_v1 }
  0x54   : > { %703 = vmatprep.subr.bf16.mxu1 %v1032_v2 }
  0x56   : > { %663 = vmatpush1.bf16.msra.mxu0 %v1034_v3 }
  0x57   : > { %704 = vmatpush1.bf16.msra.mxu1 %v1035_v4 }
  0x59   : > { %665 = vmatmul.mubr.bf16.vlgmr.msra.gmra.mrb[0].mxu0 %v840_v5 }
  0x5a   : > { %706 = vmatmul.mubr.bf16.vlgmr.msra.gmra.mrb[0].mxu1 %v842_v6 }
 0x12c   : > { %v666_v7 = vpop.f32.mrb[0].mxu0 }
 0x12d   : > { %v707_v9 = vpop.f32.mrb[0].mxu1  ;;  %v668_v11 = vpop.f32.mrb[1].mxu0  ;;  %721 = sbr.rel (%p908_p7) target bundleno = 324 (0x144), region = 40 }
 0x12e   : > { %v708_v10 = vadd.f32 %v707_v9, %v666_v7  ;;  %v709_v13 = vpop.f32.mrb[1].mxu1  ;;  %v670_v15 = vpop.f32.mrb[2].mxu0 }
 0x12f   : > { %v710_v14 = vadd.f32 %v709_v13, %v668_v11  ;;  %v711_v16 = vpop.f32.mrb[2].mxu1  ;;  %v671_v18 = vpop.f32.mrb[3].mxu0 }
 0x130   : > { %v714_v17 = vadd.f32 %v708_v10, %v230_v8  ;;  %v712_v19 = vpop.f32.mrb[3].mxu1 }
 0x131   : > { %v715_v20 = vadd.f32 %v710_v14, %v231_v12 }
 0x132   : > { %716 = vst [vmem:[#allocation2] sm:$0xff] %v714_v17 }
 0x133   : > { %717 = vst [vmem:[#allocation2 + $0x8] sm:$0xff] %v715_v20 }
 0x139   : > { %v722_v26 = vld [vmem:[#allocation2] sm:$0xff] }
 0x13a   : > { %v723_v27 = vld [vmem:[#allocation2 + $0x8] sm:$0xff]  ;;  %v736_v30 = vadd.f32 %v729_v28, %v722_v26 }
 0x13b   : > { %v737_v31 = vadd.f32 %v733_v29, %v723_v27 }
 0x13c   : > { %v738_v32 = vmul.f32 0.1, %v736_v30 }
 0x13d   : > { %v739_v33 = vmul.f32 0.1, %v737_v31 }
 0x13e   : > { %v740_v34 = vmax.f32 %v736_v30, %v738_v32 }
 0x13f   : > { %v741_v35 = vmax.f32 %v737_v31, %v739_v33 }
 0x141   : > { %v914_v36 = vpack.c.bf16 %v741_v35, %v740_v34 }
 0x143   : > { %750 = vst [vmem:[%s1203_s3] sm:$0xff] %v914_v36 }
 0x144 PF: > { %s13_s14 = sadd.s32 1, %s1062_s14   ;;  %s1204_s12 = smov %s1058_s13 }
 0x145   : > { %p10_p8 = scmp.ge.s32.totalorder %s13_s14, 6   ;;  %s1205_s13 = smov %s1207_s15 }
 0x147   :  { %12 = sbr.rel (!%p10_p8) target bundleno = 2 (0x2), region = 73 }

</bundles_post_ra>
